<compile_context>
chip_gen: v7x
topology: tpu7x:2x2x1
jax: 0.10.0
libtpu: 0.0.40
codegen_flags: <defaults>
</compile_context>

<pallas_src>
import jax
import jax.numpy as jnp
from jax.experimental import pallas as pl
from jax.experimental.pallas import tpu as pltpu


def unfilt_backproj_3d_transpose_conv(y, W, *,
                                      max_block_bytes=2 * 1024 * 1024,
                                      max_unroll=8):
    """Equivalent of F.conv_transpose3d(y, W, bias=None, stride=W.shape[-3:])."""
    B, K, n1, n2, n3 = y.shape
    Kw, out_c, b1, b2, b3 = W.shape
    assert Kw == K and out_c == 1

    D1, D2, D3 = n1 * b1, n2 * b2, n3 * b3
    f32 = jnp.float32

    # ---- tiny constant operands built once in the wrapper (negligible) ------
    # wbig[k, p1, i2*b2+p2, i3*b3+p3] = W[k, 0, p1, p2, p3]
    wbig = jnp.tile(W[:, 0].astype(f32), (1, 1, n2, n3))               # (K, b1, D2, D3)
    # lmat[i2*b2+p2, j] = 1 iff j == i2   (sublane upsample selector)
    lmat = jnp.kron(jnp.eye(n2, dtype=f32), jnp.ones((b2, 1), f32))    # (D2, n2)
    # rmat[j, i3*b3+p3] = 1 iff j == i3   (lane upsample selector)
    rmat = jnp.kron(jnp.eye(n3, dtype=f32), jnp.ones((1, b3), f32))    # (n3, D3)

    # ---- pick how many coarse i1-rows each grid step produces ---------------
    blk_bytes = b1 * D2 * D3 * 4          # one i1-row of output, f32
    tn1 = 1
    for d in range(1, n1 + 1):
        if n1 % d == 0 and d <= max_unroll and d * blk_bytes <= max_block_bytes:
            tn1 = d
    grid = (B, n1 // tn1)

    def kernel(y_ref, wb_ref, l_ref, r_ref, o_ref):
        # y_ref : (K, tn1, n2, n3)     coded measurements for tn1 coarse rows
        # wb_ref: (K, b1, D2, D3)      pre-tiled coding filters
        # l_ref : (D2, n2), r_ref: (n3, D3)   0/1 upsample selectors
        # o_ref : (tn1, b1, D2, D3)    output slab already in the final layout
        lm = l_ref[...]
        rm = r_ref[...]
        # Hoist the K*b1 filter planes (reused across all tn1 rows).
        wt = [[wb_ref[k, p1, :, :] for p1 in range(b1)] for k in range(K)]
        for t in range(tn1):
            # Exact nearest-neighbour upsample of the K coarse planes to
            # (D2, D3) via two 0/1 selection matmuls (MXU).
            ups = []
            for k in range(K):
                u = jnp.dot(y_ref[k, t, :, :].astype(f32), rm,
                            preferred_element_type=f32)                # (n2, D3)
                ups.append(jnp.dot(lm, u, preferred_element_type=f32))  # (D2, D3)
            # K-term reduction as VPU FMAs against the pre-tiled filters.
            for p1 in range(b1):
                acc = ups[0] * wt[0][p1]
                for k in range(1, K):
                    acc = acc + ups[k] * wt[k][p1]
                o_ref[t, p1, :, :] = acc.astype(o_ref.dtype)

    out = pl.pallas_call(
        kernel,
        out_shape=jax.ShapeDtypeStruct((B, n1, b1, D2, D3), y.dtype),
        grid=grid,
        in_specs=[
            # y used directly in NCDHW layout: no wrapper transpose/reshape.
            pl.BlockSpec((None, K, tn1, n2, n3), lambda b, j: (b, 0, j, 0, 0)),
            pl.BlockSpec((K, b1, D2, D3), lambda b, j: (0, 0, 0, 0)),
            pl.BlockSpec((D2, n2), lambda b, j: (0, 0)),
            pl.BlockSpec((n3, D3), lambda b, j: (0, 0)),
        ],
        out_specs=pl.BlockSpec((None, tn1, b1, D2, D3),
                               lambda b, j: (b, j, 0, 0, 0)),
        compiler_params=pltpu.CompilerParams(
            dimension_semantics=("parallel", "parallel")),
        # NOTE: per-step VMEM is small (<= ~max_block_bytes per buffer); for very
        # large n2*n3 raise vmem_limit_bytes, budgeting against 64 MiB on v7x.
    )(y, wbig, lmat, rmat)

    # Only free reshapes remain: merge adjacent (n1, b1) -> n1*b1 and add the
    # singleton channel dim.  No transpose of the large output anywhere.
    return out.reshape(B, 1, D1, D2, D3)


def _reference(y, W):
    # Pure-JAX reference of conv_transpose3d with stride == kernel size.
    B, K, n1, n2, n3 = y.shape
    _, _, b1, b2, b3 = W.shape
    out = jnp.einsum("bkxyz,kpqr->bxpyqzr", y, W[:, 0])
    return out.reshape(B, 1, n1 * b1, n2 * b2, n3 * b3)


if __name__ == "__main__":
    key = jax.random.PRNGKey(0)
    k_y, k_w = jax.random.split(key)

    # Small shapes consistent with the module:
    #   batch=2, K=4 coded channels, 8^3 coded volume, 2^3 coding kernel.
    B, K = 2, 4
    n1 = n2 = n3 = 8
    b1 = b2 = b3 = 2

    y = jax.random.normal(k_y, (B, K, n1, n2, n3), dtype=jnp.float32)
    # Deterministic synthetic coding matrix (module has no learned params).
    W = jax.random.normal(k_w, (K, 1, b1, b2, b3), dtype=jnp.float32)

    xhat = unfilt_backproj_3d_transpose_conv(y, W)
    xhat = jax.block_until_ready(xhat)

    ref = _reference(y, W)
    assert xhat.shape == (B, 1, n1 * b1, n2 * b2, n3 * b3), xhat.shape
    assert jnp.allclose(xhat, ref, atol=1e-5, rtol=1e-5), \
        float(jnp.max(jnp.abs(xhat - ref)))

    print("KERNEL_OK")
</pallas_src>

<mosaic_0001>
module attributes {stable_mosaic.version = 11 : i64} {
  func.func @kernel(%arg0: i32, %arg1: i32, %arg2: memref<1x4x8x8x8xf32, #tpu.memory_space<vmem>>, %arg3: memref<4x2x16x16xf32, #tpu.memory_space<vmem>>, %arg4: memref<16x8xf32, #tpu.memory_space<vmem>>, %arg5: memref<8x16xf32, #tpu.memory_space<vmem>>, %arg6: memref<1x8x2x16x16xf32, #tpu.memory_space<vmem>>) attributes {dimension_semantics = [#tpu.dimension_semantics<parallel>, #tpu.dimension_semantics<parallel>], iteration_bounds = array<i64: 2, 1>, scalar_prefetch = 0 : i64, scratch_operands = 0 : i64, tpu.core_type = #tpu.core_type<tc>, window_params = [{transform_indices = @transform_0, window_bounds = array<i64: 1, 4, 8, 8, 8>}, {pipeline_mode = #tpu.pipeline_mode<synchronous>, transform_indices = @transform_1, window_bounds = array<i64: 4, 2, 16, 16>}, {pipeline_mode = #tpu.pipeline_mode<synchronous>, transform_indices = @transform_2, window_bounds = array<i64: 16, 8>}, {pipeline_mode = #tpu.pipeline_mode<synchronous>, transform_indices = @transform_3, window_bounds = array<i64: 8, 16>}, {transform_indices = @transform_4, window_bounds = array<i64: 1, 8, 2, 16, 16>}]} {
    %c0 = arith.constant 0 : index
    %c0_0 = arith.constant 0 : index
    %0 = vector.load %arg4[%c0, %c0_0] : memref<16x8xf32, #tpu.memory_space<vmem>>, vector<16x8xf32>
    %c0_1 = arith.constant 0 : index
    %c0_2 = arith.constant 0 : index
    %1 = vector.load %arg5[%c0_1, %c0_2] : memref<8x16xf32, #tpu.memory_space<vmem>>, vector<8x16xf32>
    %c0_3 = arith.constant 0 : index
    %c0_4 = arith.constant 0 : index
    %c0_5 = arith.constant 0 : index
    %c0_6 = arith.constant 0 : index
    %2 = vector.load %arg3[%c0_3, %c0_4, %c0_5, %c0_6] : memref<4x2x16x16xf32, #tpu.memory_space<vmem>>, vector<1x1x16x16xf32>
    %3 = vector.shape_cast %2 : vector<1x1x16x16xf32> to vector<16x16xf32>
    %c0_7 = arith.constant 0 : index
    %c1 = arith.constant 1 : index
    %c0_8 = arith.constant 0 : index
    %c0_9 = arith.constant 0 : index
    %4 = vector.load %arg3[%c0_7, %c1, %c0_8, %c0_9] : memref<4x2x16x16xf32, #tpu.memory_space<vmem>>, vector<1x1x16x16xf32>
    %5 = vector.shape_cast %4 : vector<1x1x16x16xf32> to vector<16x16xf32>
    %c1_10 = arith.constant 1 : index
    %c0_11 = arith.constant 0 : index
    %c0_12 = arith.constant 0 : index
    %c0_13 = arith.constant 0 : index
    %6 = vector.load %arg3[%c1_10, %c0_11, %c0_12, %c0_13] : memref<4x2x16x16xf32, #tpu.memory_space<vmem>>, vector<1x1x16x16xf32>
    %7 = vector.shape_cast %6 : vector<1x1x16x16xf32> to vector<16x16xf32>
    %c1_14 = arith.constant 1 : index
    %c1_15 = arith.constant 1 : index
    %c0_16 = arith.constant 0 : index
    %c0_17 = arith.constant 0 : index
    %8 = vector.load %arg3[%c1_14, %c1_15, %c0_16, %c0_17] : memref<4x2x16x16xf32, #tpu.memory_space<vmem>>, vector<1x1x16x16xf32>
    %9 = vector.shape_cast %8 : vector<1x1x16x16xf32> to vector<16x16xf32>
    %c2 = arith.constant 2 : index
    %c0_18 = arith.constant 0 : index
    %c0_19 = arith.constant 0 : index
    %c0_20 = arith.constant 0 : index
    %10 = vector.load %arg3[%c2, %c0_18, %c0_19, %c0_20] : memref<4x2x16x16xf32, #tpu.memory_space<vmem>>, vector<1x1x16x16xf32>
    %11 = vector.shape_cast %10 : vector<1x1x16x16xf32> to vector<16x16xf32>
    %c2_21 = arith.constant 2 : index
    %c1_22 = arith.constant 1 : index
    %c0_23 = arith.constant 0 : index
    %c0_24 = arith.constant 0 : index
    %12 = vector.load %arg3[%c2_21, %c1_22, %c0_23, %c0_24] : memref<4x2x16x16xf32, #tpu.memory_space<vmem>>, vector<1x1x16x16xf32>
    %13 = vector.shape_cast %12 : vector<1x1x16x16xf32> to vector<16x16xf32>
    %c3 = arith.constant 3 : index
    %c0_25 = arith.constant 0 : index
    %c0_26 = arith.constant 0 : index
    %c0_27 = arith.constant 0 : index
    %14 = vector.load %arg3[%c3, %c0_25, %c0_26, %c0_27] : memref<4x2x16x16xf32, #tpu.memory_space<vmem>>, vector<1x1x16x16xf32>
    %15 = vector.shape_cast %14 : vector<1x1x16x16xf32> to vector<16x16xf32>
    %c3_28 = arith.constant 3 : index
    %c1_29 = arith.constant 1 : index
    %c0_30 = arith.constant 0 : index
    %c0_31 = arith.constant 0 : index
    %16 = vector.load %arg3[%c3_28, %c1_29, %c0_30, %c0_31] : memref<4x2x16x16xf32, #tpu.memory_space<vmem>>, vector<1x1x16x16xf32>
    %17 = vector.shape_cast %16 : vector<1x1x16x16xf32> to vector<16x16xf32>
    %c0_32 = arith.constant 0 : index
    %c0_33 = arith.constant 0 : index
    %c0_34 = arith.constant 0 : index
    %c0_35 = arith.constant 0 : index
    %c0_36 = arith.constant 0 : index
    %18 = vector.load %arg2[%c0_32, %c0_33, %c0_34, %c0_35, %c0_36] : memref<1x4x8x8x8xf32, #tpu.memory_space<vmem>>, vector<1x1x1x8x8xf32>
    %19 = vector.shape_cast %18 : vector<1x1x1x8x8xf32> to vector<8x8xf32>
    %cst = arith.constant dense<0.000000e+00> : vector<8x16xf32>
    %20 = tpu.matmul %19, %1, %cst {dimension_numbers = #tpu.dot_dimension_numbers<[1], [0], [0], [1], [0, 0, 1, 1], [], []>} : vector<8x8xf32>, vector<8x16xf32>, vector<8x16xf32> -> vector<8x16xf32>
    %cst_37 = arith.constant dense<0.000000e+00> : vector<16x16xf32>
    %21 = tpu.matmul %0, %20, %cst_37 {dimension_numbers = #tpu.dot_dimension_numbers<[1], [0], [0], [1], [0, 0, 1, 1], [], []>} : vector<16x8xf32>, vector<8x16xf32>, vector<16x16xf32> -> vector<16x16xf32>
    %c0_38 = arith.constant 0 : index
    %c1_39 = arith.constant 1 : index
    %c0_40 = arith.constant 0 : index
    %c0_41 = arith.constant 0 : index
    %c0_42 = arith.constant 0 : index
    %22 = vector.load %arg2[%c0_38, %c1_39, %c0_40, %c0_41, %c0_42] : memref<1x4x8x8x8xf32, #tpu.memory_space<vmem>>, vector<1x1x1x8x8xf32>
    %23 = vector.shape_cast %22 : vector<1x1x1x8x8xf32> to vector<8x8xf32>
    %cst_43 = arith.constant dense<0.000000e+00> : vector<8x16xf32>
    %24 = tpu.matmul %23, %1, %cst_43 {dimension_numbers = #tpu.dot_dimension_numbers<[1], [0], [0], [1], [0, 0, 1, 1], [], []>} : vector<8x8xf32>, vector<8x16xf32>, vector<8x16xf32> -> vector<8x16xf32>
    %cst_44 = arith.constant dense<0.000000e+00> : vector<16x16xf32>
    %25 = tpu.matmul %0, %24, %cst_44 {dimension_numbers = #tpu.dot_dimension_numbers<[1], [0], [0], [1], [0, 0, 1, 1], [], []>} : vector<16x8xf32>, vector<8x16xf32>, vector<16x16xf32> -> vector<16x16xf32>
    %c0_45 = arith.constant 0 : index
    %c2_46 = arith.constant 2 : index
    %c0_47 = arith.constant 0 : index
    %c0_48 = arith.constant 0 : index
    %c0_49 = arith.constant 0 : index
    %26 = vector.load %arg2[%c0_45, %c2_46, %c0_47, %c0_48, %c0_49] : memref<1x4x8x8x8xf32, #tpu.memory_space<vmem>>, vector<1x1x1x8x8xf32>
    %27 = vector.shape_cast %26 : vector<1x1x1x8x8xf32> to vector<8x8xf32>
    %cst_50 = arith.constant dense<0.000000e+00> : vector<8x16xf32>
    %28 = tpu.matmul %27, %1, %cst_50 {dimension_numbers = #tpu.dot_dimension_numbers<[1], [0], [0], [1], [0, 0, 1, 1], [], []>} : vector<8x8xf32>, vector<8x16xf32>, vector<8x16xf32> -> vector<8x16xf32>
    %cst_51 = arith.constant dense<0.000000e+00> : vector<16x16xf32>
    %29 = tpu.matmul %0, %28, %cst_51 {dimension_numbers = #tpu.dot_dimension_numbers<[1], [0], [0], [1], [0, 0, 1, 1], [], []>} : vector<16x8xf32>, vector<8x16xf32>, vector<16x16xf32> -> vector<16x16xf32>
    %c0_52 = arith.constant 0 : index
    %c3_53 = arith.constant 3 : index
    %c0_54 = arith.constant 0 : index
    %c0_55 = arith.constant 0 : index
    %c0_56 = arith.constant 0 : index
    %30 = vector.load %arg2[%c0_52, %c3_53, %c0_54, %c0_55, %c0_56] : memref<1x4x8x8x8xf32, #tpu.memory_space<vmem>>, vector<1x1x1x8x8xf32>
    %31 = vector.shape_cast %30 : vector<1x1x1x8x8xf32> to vector<8x8xf32>
    %cst_57 = arith.constant dense<0.000000e+00> : vector<8x16xf32>
    %32 = tpu.matmul %31, %1, %cst_57 {dimension_numbers = #tpu.dot_dimension_numbers<[1], [0], [0], [1], [0, 0, 1, 1], [], []>} : vector<8x8xf32>, vector<8x16xf32>, vector<8x16xf32> -> vector<8x16xf32>
    %cst_58 = arith.constant dense<0.000000e+00> : vector<16x16xf32>
    %33 = tpu.matmul %0, %32, %cst_58 {dimension_numbers = #tpu.dot_dimension_numbers<[1], [0], [0], [1], [0, 0, 1, 1], [], []>} : vector<16x8xf32>, vector<8x16xf32>, vector<16x16xf32> -> vector<16x16xf32>
    %34 = arith.mulf %21, %3 : vector<16x16xf32>
    %35 = arith.mulf %25, %7 : vector<16x16xf32>
    %36 = arith.addf %34, %35 : vector<16x16xf32>
    %37 = arith.mulf %29, %11 : vector<16x16xf32>
    %38 = arith.addf %36, %37 : vector<16x16xf32>
    %39 = arith.mulf %33, %15 : vector<16x16xf32>
    %40 = arith.addf %38, %39 : vector<16x16xf32>
    %c0_59 = arith.constant 0 : index
    %c0_60 = arith.constant 0 : index
    %c0_61 = arith.constant 0 : index
    %c0_62 = arith.constant 0 : index
    %c0_63 = arith.constant 0 : index
    %41 = vector.load %arg6[%c0_59, %c0_60, %c0_61, %c0_62, %c0_63] : memref<1x8x2x16x16xf32, #tpu.memory_space<vmem>>, vector<1x1x1x16x16xf32>
    %42 = vector.shape_cast %41 : vector<1x1x1x16x16xf32> to vector<16x16xf32>
    %43 = vector.shape_cast %40 : vector<16x16xf32> to vector<1x1x1x16x16xf32>
    tpu.vector_store %arg6[%c0_59, %c0_60, %c0_61, %c0_62, %c0_63], %43 {strides = array<i32>} : memref<1x8x2x16x16xf32, #tpu.memory_space<vmem>>, vector<1x1x1x16x16xf32>,
    %44 = arith.mulf %21, %5 : vector<16x16xf32>
    %45 = arith.mulf %25, %9 : vector<16x16xf32>
    %46 = arith.addf %44, %45 : vector<16x16xf32>
    %47 = arith.mulf %29, %13 : vector<16x16xf32>
    %48 = arith.addf %46, %47 : vector<16x16xf32>
    %49 = arith.mulf %33, %17 : vector<16x16xf32>
    %50 = arith.addf %48, %49 : vector<16x16xf32>
    %c0_64 = arith.constant 0 : index
    %c0_65 = arith.constant 0 : index
    %c1_66 = arith.constant 1 : index
    %c0_67 = arith.constant 0 : index
    %c0_68 = arith.constant 0 : index
    %51 = vector.load %arg6[%c0_64, %c0_65, %c1_66, %c0_67, %c0_68] : memref<1x8x2x16x16xf32, #tpu.memory_space<vmem>>, vector<1x1x1x16x16xf32>
    %52 = vector.shape_cast %51 : vector<1x1x1x16x16xf32> to vector<16x16xf32>
    %53 = vector.shape_cast %50 : vector<16x16xf32> to vector<1x1x1x16x16xf32>
    tpu.vector_store %arg6[%c0_64, %c0_65, %c1_66, %c0_67, %c0_68], %53 {strides = array<i32>} : memref<1x8x2x16x16xf32, #tpu.memory_space<vmem>>, vector<1x1x1x16x16xf32>,
    %c0_69 = arith.constant 0 : index
    %c0_70 = arith.constant 0 : index
    %c1_71 = arith.constant 1 : index
    %c0_72 = arith.constant 0 : index
    %c0_73 = arith.constant 0 : index
    %54 = vector.load %arg2[%c0_69, %c0_70, %c1_71, %c0_72, %c0_73] : memref<1x4x8x8x8xf32, #tpu.memory_space<vmem>>, vector<1x1x1x8x8xf32>
    %55 = vector.shape_cast %54 : vector<1x1x1x8x8xf32> to vector<8x8xf32>
    %cst_74 = arith.constant dense<0.000000e+00> : vector<8x16xf32>
    %56 = tpu.matmul %55, %1, %cst_74 {dimension_numbers = #tpu.dot_dimension_numbers<[1], [0], [0], [1], [0, 0, 1, 1], [], []>} : vector<8x8xf32>, vector<8x16xf32>, vector<8x16xf32> -> vector<8x16xf32>
    %cst_75 = arith.constant dense<0.000000e+00> : vector<16x16xf32>
    %57 = tpu.matmul %0, %56, %cst_75 {dimension_numbers = #tpu.dot_dimension_numbers<[1], [0], [0], [1], [0, 0, 1, 1], [], []>} : vector<16x8xf32>, vector<8x16xf32>, vector<16x16xf32> -> vector<16x16xf32>
    %c0_76 = arith.constant 0 : index
    %c1_77 = arith.constant 1 : index
    %c1_78 = arith.constant 1 : index
    %c0_79 = arith.constant 0 : index
    %c0_80 = arith.constant 0 : index
    %58 = vector.load %arg2[%c0_76, %c1_77, %c1_78, %c0_79, %c0_80] : memref<1x4x8x8x8xf32, #tpu.memory_space<vmem>>, vector<1x1x1x8x8xf32>
    %59 = vector.shape_cast %58 : vector<1x1x1x8x8xf32> to vector<8x8xf32>
    %cst_81 = arith.constant dense<0.000000e+00> : vector<8x16xf32>
    %60 = tpu.matmul %59, %1, %cst_81 {dimension_numbers = #tpu.dot_dimension_numbers<[1], [0], [0], [1], [0, 0, 1, 1], [], []>} : vector<8x8xf32>, vector<8x16xf32>, vector<8x16xf32> -> vector<8x16xf32>
    %cst_82 = arith.constant dense<0.000000e+00> : vector<16x16xf32>
    %61 = tpu.matmul %0, %60, %cst_82 {dimension_numbers = #tpu.dot_dimension_numbers<[1], [0], [0], [1], [0, 0, 1, 1], [], []>} : vector<16x8xf32>, vector<8x16xf32>, vector<16x16xf32> -> vector<16x16xf32>
    %c0_83 = arith.constant 0 : index
    %c2_84 = arith.constant 2 : index
    %c1_85 = arith.constant 1 : index
    %c0_86 = arith.constant 0 : index
    %c0_87 = arith.constant 0 : index
    %62 = vector.load %arg2[%c0_83, %c2_84, %c1_85, %c0_86, %c0_87] : memref<1x4x8x8x8xf32, #tpu.memory_space<vmem>>, vector<1x1x1x8x8xf32>
    %63 = vector.shape_cast %62 : vector<1x1x1x8x8xf32> to vector<8x8xf32>
    %cst_88 = arith.constant dense<0.000000e+00> : vector<8x16xf32>
    %64 = tpu.matmul %63, %1, %cst_88 {dimension_numbers = #tpu.dot_dimension_numbers<[1], [0], [0], [1], [0, 0, 1, 1], [], []>} : vector<8x8xf32>, vector<8x16xf32>, vector<8x16xf32> -> vector<8x16xf32>
    %cst_89 = arith.constant dense<0.000000e+00> : vector<16x16xf32>
    %65 = tpu.matmul %0, %64, %cst_89 {dimension_numbers = #tpu.dot_dimension_numbers<[1], [0], [0], [1], [0, 0, 1, 1], [], []>} : vector<16x8xf32>, vector<8x16xf32>, vector<16x16xf32> -> vector<16x16xf32>
    %c0_90 = arith.constant 0 : index
    %c3_91 = arith.constant 3 : index
    %c1_92 = arith.constant 1 : index
    %c0_93 = arith.constant 0 : index
    %c0_94 = arith.constant 0 : index
    %66 = vector.load %arg2[%c0_90, %c3_91, %c1_92, %c0_93, %c0_94] : memref<1x4x8x8x8xf32, #tpu.memory_space<vmem>>, vector<1x1x1x8x8xf32>
    %67 = vector.shape_cast %66 : vector<1x1x1x8x8xf32> to vector<8x8xf32>
    %cst_95 = arith.constant dense<0.000000e+00> : vector<8x16xf32>
    %68 = tpu.matmul %67, %1, %cst_95 {dimension_numbers = #tpu.dot_dimension_numbers<[1], [0], [0], [1], [0, 0, 1, 1], [], []>} : vector<8x8xf32>, vector<8x16xf32>, vector<8x16xf32> -> vector<8x16xf32>
    %cst_96 = arith.constant dense<0.000000e+00> : vector<16x16xf32>
    %69 = tpu.matmul %0, %68, %cst_96 {dimension_numbers = #tpu.dot_dimension_numbers<[1], [0], [0], [1], [0, 0, 1, 1], [], []>} : vector<16x8xf32>, vector<8x16xf32>, vector<16x16xf32> -> vector<16x16xf32>
    %70 = arith.mulf %57, %3 : vector<16x16xf32>
    %71 = arith.mulf %61, %7 : vector<16x16xf32>
    %72 = arith.addf %70, %71 : vector<16x16xf32>
    %73 = arith.mulf %65, %11 : vector<16x16xf32>
    %74 = arith.addf %72, %73 : vector<16x16xf32>
    %75 = arith.mulf %69, %15 : vector<16x16xf32>
    %76 = arith.addf %74, %75 : vector<16x16xf32>
    %c0_97 = arith.constant 0 : index
    %c1_98 = arith.constant 1 : index
    %c0_99 = arith.constant 0 : index
    %c0_100 = arith.constant 0 : index
    %c0_101 = arith.constant 0 : index
    %77 = vector.load %arg6[%c0_97, %c1_98, %c0_99, %c0_100, %c0_101] : memref<1x8x2x16x16xf32, #tpu.memory_space<vmem>>, vector<1x1x1x16x16xf32>
    %78 = vector.shape_cast %77 : vector<1x1x1x16x16xf32> to vector<16x16xf32>
    %79 = vector.shape_cast %76 : vector<16x16xf32> to vector<1x1x1x16x16xf32>
    tpu.vector_store %arg6[%c0_97, %c1_98, %c0_99, %c0_100, %c0_101], %79 {strides = array<i32>} : memref<1x8x2x16x16xf32, #tpu.memory_space<vmem>>, vector<1x1x1x16x16xf32>,
    %80 = arith.mulf %57, %5 : vector<16x16xf32>
    %81 = arith.mulf %61, %9 : vector<16x16xf32>
    %82 = arith.addf %80, %81 : vector<16x16xf32>
    %83 = arith.mulf %65, %13 : vector<16x16xf32>
    %84 = arith.addf %82, %83 : vector<16x16xf32>
    %85 = arith.mulf %69, %17 : vector<16x16xf32>
    %86 = arith.addf %84, %85 : vector<16x16xf32>
    %c0_102 = arith.constant 0 : index
    %c1_103 = arith.constant 1 : index
    %c1_104 = arith.constant 1 : index
    %c0_105 = arith.constant 0 : index
    %c0_106 = arith.constant 0 : index
    %87 = vector.load %arg6[%c0_102, %c1_103, %c1_104, %c0_105, %c0_106] : memref<1x8x2x16x16xf32, #tpu.memory_space<vmem>>, vector<1x1x1x16x16xf32>
    %88 = vector.shape_cast %87 : vector<1x1x1x16x16xf32> to vector<16x16xf32>
    %89 = vector.shape_cast %86 : vector<16x16xf32> to vector<1x1x1x16x16xf32>
    tpu.vector_store %arg6[%c0_102, %c1_103, %c1_104, %c0_105, %c0_106], %89 {strides = array<i32>} : memref<1x8x2x16x16xf32, #tpu.memory_space<vmem>>, vector<1x1x1x16x16xf32>,
    %c0_107 = arith.constant 0 : index
    %c0_108 = arith.constant 0 : index
    %c2_109 = arith.constant 2 : index
    %c0_110 = arith.constant 0 : index
    %c0_111 = arith.constant 0 : index
    %90 = vector.load %arg2[%c0_107, %c0_108, %c2_109, %c0_110, %c0_111] : memref<1x4x8x8x8xf32, #tpu.memory_space<vmem>>, vector<1x1x1x8x8xf32>
    %91 = vector.shape_cast %90 : vector<1x1x1x8x8xf32> to vector<8x8xf32>
    %cst_112 = arith.constant dense<0.000000e+00> : vector<8x16xf32>
    %92 = tpu.matmul %91, %1, %cst_112 {dimension_numbers = #tpu.dot_dimension_numbers<[1], [0], [0], [1], [0, 0, 1, 1], [], []>} : vector<8x8xf32>, vector<8x16xf32>, vector<8x16xf32> -> vector<8x16xf32>
    %cst_113 = arith.constant dense<0.000000e+00> : vector<16x16xf32>
    %93 = tpu.matmul %0, %92, %cst_113 {dimension_numbers = #tpu.dot_dimension_numbers<[1], [0], [0], [1], [0, 0, 1, 1], [], []>} : vector<16x8xf32>, vector<8x16xf32>, vector<16x16xf32> -> vector<16x16xf32>
    %c0_114 = arith.constant 0 : index
    %c1_115 = arith.constant 1 : index
    %c2_116 = arith.constant 2 : index
    %c0_117 = arith.constant 0 : index
    %c0_118 = arith.constant 0 : index
    %94 = vector.load %arg2[%c0_114, %c1_115, %c2_116, %c0_117, %c0_118] : memref<1x4x8x8x8xf32, #tpu.memory_space<vmem>>, vector<1x1x1x8x8xf32>
    %95 = vector.shape_cast %94 : vector<1x1x1x8x8xf32> to vector<8x8xf32>
    %cst_119 = arith.constant dense<0.000000e+00> : vector<8x16xf32>
    %96 = tpu.matmul %95, %1, %cst_119 {dimension_numbers = #tpu.dot_dimension_numbers<[1], [0], [0], [1], [0, 0, 1, 1], [], []>} : vector<8x8xf32>, vector<8x16xf32>, vector<8x16xf32> -> vector<8x16xf32>
    %cst_120 = arith.constant dense<0.000000e+00> : vector<16x16xf32>
    %97 = tpu.matmul %0, %96, %cst_120 {dimension_numbers = #tpu.dot_dimension_numbers<[1], [0], [0], [1], [0, 0, 1, 1], [], []>} : vector<16x8xf32>, vector<8x16xf32>, vector<16x16xf32> -> vector<16x16xf32>
    %c0_121 = arith.constant 0 : index
    %c2_122 = arith.constant 2 : index
    %c2_123 = arith.constant 2 : index
    %c0_124 = arith.constant 0 : index
    %c0_125 = arith.constant 0 : index
    %98 = vector.load %arg2[%c0_121, %c2_122, %c2_123, %c0_124, %c0_125] : memref<1x4x8x8x8xf32, #tpu.memory_space<vmem>>, vector<1x1x1x8x8xf32>
    %99 = vector.shape_cast %98 : vector<1x1x1x8x8xf32> to vector<8x8xf32>
    %cst_126 = arith.constant dense<0.000000e+00> : vector<8x16xf32>
    %100 = tpu.matmul %99, %1, %cst_126 {dimension_numbers = #tpu.dot_dimension_numbers<[1], [0], [0], [1], [0, 0, 1, 1], [], []>} : vector<8x8xf32>, vector<8x16xf32>, vector<8x16xf32> -> vector<8x16xf32>
    %cst_127 = arith.constant dense<0.000000e+00> : vector<16x16xf32>
    %101 = tpu.matmul %0, %100, %cst_127 {dimension_numbers = #tpu.dot_dimension_numbers<[1], [0], [0], [1], [0, 0, 1, 1], [], []>} : vector<16x8xf32>, vector<8x16xf32>, vector<16x16xf32> -> vector<16x16xf32>
    %c0_128 = arith.constant 0 : index
    %c3_129 = arith.constant 3 : index
    %c2_130 = arith.constant 2 : index
    %c0_131 = arith.constant 0 : index
    %c0_132 = arith.constant 0 : index
    %102 = vector.load %arg2[%c0_128, %c3_129, %c2_130, %c0_131, %c0_132] : memref<1x4x8x8x8xf32, #tpu.memory_space<vmem>>, vector<1x1x1x8x8xf32>
    %103 = vector.shape_cast %102 : vector<1x1x1x8x8xf32> to vector<8x8xf32>
    %cst_133 = arith.constant dense<0.000000e+00> : vector<8x16xf32>
    %104 = tpu.matmul %103, %1, %cst_133 {dimension_numbers = #tpu.dot_dimension_numbers<[1], [0], [0], [1], [0, 0, 1, 1], [], []>} : vector<8x8xf32>, vector<8x16xf32>, vector<8x16xf32> -> vector<8x16xf32>
    %cst_134 = arith.constant dense<0.000000e+00> : vector<16x16xf32>
    %105 = tpu.matmul %0, %104, %cst_134 {dimension_numbers = #tpu.dot_dimension_numbers<[1], [0], [0], [1], [0, 0, 1, 1], [], []>} : vector<16x8xf32>, vector<8x16xf32>, vector<16x16xf32> -> vector<16x16xf32>
    %106 = arith.mulf %93, %3 : vector<16x16xf32>
    %107 = arith.mulf %97, %7 : vector<16x16xf32>
    %108 = arith.addf %106, %107 : vector<16x16xf32>
    %109 = arith.mulf %101, %11 : vector<16x16xf32>
    %110 = arith.addf %108, %109 : vector<16x16xf32>
    %111 = arith.mulf %105, %15 : vector<16x16xf32>
    %112 = arith.addf %110, %111 : vector<16x16xf32>
    %c0_135 = arith.constant 0 : index
    %c2_136 = arith.constant 2 : index
    %c0_137 = arith.constant 0 : index
    %c0_138 = arith.constant 0 : index
    %c0_139 = arith.constant 0 : index
    %113 = vector.load %arg6[%c0_135, %c2_136, %c0_137, %c0_138, %c0_139] : memref<1x8x2x16x16xf32, #tpu.memory_space<vmem>>, vector<1x1x1x16x16xf32>
    %114 = vector.shape_cast %113 : vector<1x1x1x16x16xf32> to vector<16x16xf32>
    %115 = vector.shape_cast %112 : vector<16x16xf32> to vector<1x1x1x16x16xf32>
    tpu.vector_store %arg6[%c0_135, %c2_136, %c0_137, %c0_138, %c0_139], %115 {strides = array<i32>} : memref<1x8x2x16x16xf32, #tpu.memory_space<vmem>>, vector<1x1x1x16x16xf32>,
    %116 = arith.mulf %93, %5 : vector<16x16xf32>
    %117 = arith.mulf %97, %9 : vector<16x16xf32>
    %118 = arith.addf %116, %117 : vector<16x16xf32>
    %119 = arith.mulf %101, %13 : vector<16x16xf32>
    %120 = arith.addf %118, %119 : vector<16x16xf32>
    %121 = arith.mulf %105, %17 : vector<16x16xf32>
    %122 = arith.addf %120, %121 : vector<16x16xf32>
    %c0_140 = arith.constant 0 : index
    %c2_141 = arith.constant 2 : index
    %c1_142 = arith.constant 1 : index
    %c0_143 = arith.constant 0 : index
    %c0_144 = arith.constant 0 : index
    %123 = vector.load %arg6[%c0_140, %c2_141, %c1_142, %c0_143, %c0_144] : memref<1x8x2x16x16xf32, #tpu.memory_space<vmem>>, vector<1x1x1x16x16xf32>
    %124 = vector.shape_cast %123 : vector<1x1x1x16x16xf32> to vector<16x16xf32>
    %125 = vector.shape_cast %122 : vector<16x16xf32> to vector<1x1x1x16x16xf32>
    tpu.vector_store %arg6[%c0_140, %c2_141, %c1_142, %c0_143, %c0_144], %125 {strides = array<i32>} : memref<1x8x2x16x16xf32, #tpu.memory_space<vmem>>, vector<1x1x1x16x16xf32>,
    %c0_145 = arith.constant 0 : index
    %c0_146 = arith.constant 0 : index
    %c3_147 = arith.constant 3 : index
    %c0_148 = arith.constant 0 : index
    %c0_149 = arith.constant 0 : index
    %126 = vector.load %arg2[%c0_145, %c0_146, %c3_147, %c0_148, %c0_149] : memref<1x4x8x8x8xf32, #tpu.memory_space<vmem>>, vector<1x1x1x8x8xf32>
    %127 = vector.shape_cast %126 : vector<1x1x1x8x8xf32> to vector<8x8xf32>
    %cst_150 = arith.constant dense<0.000000e+00> : vector<8x16xf32>
    %128 = tpu.matmul %127, %1, %cst_150 {dimension_numbers = #tpu.dot_dimension_numbers<[1], [0], [0], [1], [0, 0, 1, 1], [], []>} : vector<8x8xf32>, vector<8x16xf32>, vector<8x16xf32> -> vector<8x16xf32>
    %cst_151 = arith.constant dense<0.000000e+00> : vector<16x16xf32>
    %129 = tpu.matmul %0, %128, %cst_151 {dimension_numbers = #tpu.dot_dimension_numbers<[1], [0], [0], [1], [0, 0, 1, 1], [], []>} : vector<16x8xf32>, vector<8x16xf32>, vector<16x16xf32> -> vector<16x16xf32>
    %c0_152 = arith.constant 0 : index
    %c1_153 = arith.constant 1 : index
    %c3_154 = arith.constant 3 : index
    %c0_155 = arith.constant 0 : index
    %c0_156 = arith.constant 0 : index
    %130 = vector.load %arg2[%c0_152, %c1_153, %c3_154, %c0_155, %c0_156] : memref<1x4x8x8x8xf32, #tpu.memory_space<vmem>>, vector<1x1x1x8x8xf32>
    %131 = vector.shape_cast %130 : vector<1x1x1x8x8xf32> to vector<8x8xf32>
    %cst_157 = arith.constant dense<0.000000e+00> : vector<8x16xf32>
    %132 = tpu.matmul %131, %1, %cst_157 {dimension_numbers = #tpu.dot_dimension_numbers<[1], [0], [0], [1], [0, 0, 1, 1], [], []>} : vector<8x8xf32>, vector<8x16xf32>, vector<8x16xf32> -> vector<8x16xf32>
    %cst_158 = arith.constant dense<0.000000e+00> : vector<16x16xf32>
    %133 = tpu.matmul %0, %132, %cst_158 {dimension_numbers = #tpu.dot_dimension_numbers<[1], [0], [0], [1], [0, 0, 1, 1], [], []>} : vector<16x8xf32>, vector<8x16xf32>, vector<16x16xf32> -> vector<16x16xf32>
    %c0_159 = arith.constant 0 : index
    %c2_160 = arith.constant 2 : index
    %c3_161 = arith.constant 3 : index
    %c0_162 = arith.constant 0 : index
    %c0_163 = arith.constant 0 : index
    %134 = vector.load %arg2[%c0_159, %c2_160, %c3_161, %c0_162, %c0_163] : memref<1x4x8x8x8xf32, #tpu.memory_space<vmem>>, vector<1x1x1x8x8xf32>
    %135 = vector.shape_cast %134 : vector<1x1x1x8x8xf32> to vector<8x8xf32>
    %cst_164 = arith.constant dense<0.000000e+00> : vector<8x16xf32>
    %136 = tpu.matmul %135, %1, %cst_164 {dimension_numbers = #tpu.dot_dimension_numbers<[1], [0], [0], [1], [0, 0, 1, 1], [], []>} : vector<8x8xf32>, vector<8x16xf32>, vector<8x16xf32> -> vector<8x16xf32>
    %cst_165 = arith.constant dense<0.000000e+00> : vector<16x16xf32>
    %137 = tpu.matmul %0, %136, %cst_165 {dimension_numbers = #tpu.dot_dimension_numbers<[1], [0], [0], [1], [0, 0, 1, 1], [], []>} : vector<16x8xf32>, vector<8x16xf32>, vector<16x16xf32> -> vector<16x16xf32>
    %c0_166 = arith.constant 0 : index
    %c3_167 = arith.constant 3 : index
    %c3_168 = arith.constant 3 : index
    %c0_169 = arith.constant 0 : index
    %c0_170 = arith.constant 0 : index
    %138 = vector.load %arg2[%c0_166, %c3_167, %c3_168, %c0_169, %c0_170] : memref<1x4x8x8x8xf32, #tpu.memory_space<vmem>>, vector<1x1x1x8x8xf32>
    %139 = vector.shape_cast %138 : vector<1x1x1x8x8xf32> to vector<8x8xf32>
    %cst_171 = arith.constant dense<0.000000e+00> : vector<8x16xf32>
    %140 = tpu.matmul %139, %1, %cst_171 {dimension_numbers = #tpu.dot_dimension_numbers<[1], [0], [0], [1], [0, 0, 1, 1], [], []>} : vector<8x8xf32>, vector<8x16xf32>, vector<8x16xf32> -> vector<8x16xf32>
    %cst_172 = arith.constant dense<0.000000e+00> : vector<16x16xf32>
    %141 = tpu.matmul %0, %140, %cst_172 {dimension_numbers = #tpu.dot_dimension_numbers<[1], [0], [0], [1], [0, 0, 1, 1], [], []>} : vector<16x8xf32>, vector<8x16xf32>, vector<16x16xf32> -> vector<16x16xf32>
    %142 = arith.mulf %129, %3 : vector<16x16xf32>
    %143 = arith.mulf %133, %7 : vector<16x16xf32>
    %144 = arith.addf %142, %143 : vector<16x16xf32>
    %145 = arith.mulf %137, %11 : vector<16x16xf32>
    %146 = arith.addf %144, %145 : vector<16x16xf32>
    %147 = arith.mulf %141, %15 : vector<16x16xf32>
    %148 = arith.addf %146, %147 : vector<16x16xf32>
    %c0_173 = arith.constant 0 : index
    %c3_174 = arith.constant 3 : index
    %c0_175 = arith.constant 0 : index
    %c0_176 = arith.constant 0 : index
    %c0_177 = arith.constant 0 : index
    %149 = vector.load %arg6[%c0_173, %c3_174, %c0_175, %c0_176, %c0_177] : memref<1x8x2x16x16xf32, #tpu.memory_space<vmem>>, vector<1x1x1x16x16xf32>
    %150 = vector.shape_cast %149 : vector<1x1x1x16x16xf32> to vector<16x16xf32>
    %151 = vector.shape_cast %148 : vector<16x16xf32> to vector<1x1x1x16x16xf32>
    tpu.vector_store %arg6[%c0_173, %c3_174, %c0_175, %c0_176, %c0_177], %151 {strides = array<i32>} : memref<1x8x2x16x16xf32, #tpu.memory_space<vmem>>, vector<1x1x1x16x16xf32>,
    %152 = arith.mulf %129, %5 : vector<16x16xf32>
    %153 = arith.mulf %133, %9 : vector<16x16xf32>
    %154 = arith.addf %152, %153 : vector<16x16xf32>
    %155 = arith.mulf %137, %13 : vector<16x16xf32>
    %156 = arith.addf %154, %155 : vector<16x16xf32>
    %157 = arith.mulf %141, %17 : vector<16x16xf32>
    %158 = arith.addf %156, %157 : vector<16x16xf32>
    %c0_178 = arith.constant 0 : index
    %c3_179 = arith.constant 3 : index
    %c1_180 = arith.constant 1 : index
    %c0_181 = arith.constant 0 : index
    %c0_182 = arith.constant 0 : index
    %159 = vector.load %arg6[%c0_178, %c3_179, %c1_180, %c0_181, %c0_182] : memref<1x8x2x16x16xf32, #tpu.memory_space<vmem>>, vector<1x1x1x16x16xf32>
    %160 = vector.shape_cast %159 : vector<1x1x1x16x16xf32> to vector<16x16xf32>
    %161 = vector.shape_cast %158 : vector<16x16xf32> to vector<1x1x1x16x16xf32>
    tpu.vector_store %arg6[%c0_178, %c3_179, %c1_180, %c0_181, %c0_182], %161 {strides = array<i32>} : memref<1x8x2x16x16xf32, #tpu.memory_space<vmem>>, vector<1x1x1x16x16xf32>,
    %c0_183 = arith.constant 0 : index
    %c0_184 = arith.constant 0 : index
    %c4 = arith.constant 4 : index
    %c0_185 = arith.constant 0 : index
    %c0_186 = arith.constant 0 : index
    %162 = vector.load %arg2[%c0_183, %c0_184, %c4, %c0_185, %c0_186] : memref<1x4x8x8x8xf32, #tpu.memory_space<vmem>>, vector<1x1x1x8x8xf32>
    %163 = vector.shape_cast %162 : vector<1x1x1x8x8xf32> to vector<8x8xf32>
    %cst_187 = arith.constant dense<0.000000e+00> : vector<8x16xf32>
    %164 = tpu.matmul %163, %1, %cst_187 {dimension_numbers = #tpu.dot_dimension_numbers<[1], [0], [0], [1], [0, 0, 1, 1], [], []>} : vector<8x8xf32>, vector<8x16xf32>, vector<8x16xf32> -> vector<8x16xf32>
    %cst_188 = arith.constant dense<0.000000e+00> : vector<16x16xf32>
    %165 = tpu.matmul %0, %164, %cst_188 {dimension_numbers = #tpu.dot_dimension_numbers<[1], [0], [0], [1], [0, 0, 1, 1], [], []>} : vector<16x8xf32>, vector<8x16xf32>, vector<16x16xf32> -> vector<16x16xf32>
    %c0_189 = arith.constant 0 : index
    %c1_190 = arith.constant 1 : index
    %c4_191 = arith.constant 4 : index
    %c0_192 = arith.constant 0 : index
    %c0_193 = arith.constant 0 : index
    %166 = vector.load %arg2[%c0_189, %c1_190, %c4_191, %c0_192, %c0_193] : memref<1x4x8x8x8xf32, #tpu.memory_space<vmem>>, vector<1x1x1x8x8xf32>
    %167 = vector.shape_cast %166 : vector<1x1x1x8x8xf32> to vector<8x8xf32>
    %cst_194 = arith.constant dense<0.000000e+00> : vector<8x16xf32>
    %168 = tpu.matmul %167, %1, %cst_194 {dimension_numbers = #tpu.dot_dimension_numbers<[1], [0], [0], [1], [0, 0, 1, 1], [], []>} : vector<8x8xf32>, vector<8x16xf32>, vector<8x16xf32> -> vector<8x16xf32>
    %cst_195 = arith.constant dense<0.000000e+00> : vector<16x16xf32>
    %169 = tpu.matmul %0, %168, %cst_195 {dimension_numbers = #tpu.dot_dimension_numbers<[1], [0], [0], [1], [0, 0, 1, 1], [], []>} : vector<16x8xf32>, vector<8x16xf32>, vector<16x16xf32> -> vector<16x16xf32>
    %c0_196 = arith.constant 0 : index
    %c2_197 = arith.constant 2 : index
    %c4_198 = arith.constant 4 : index
    %c0_199 = arith.constant 0 : index
    %c0_200 = arith.constant 0 : index
    %170 = vector.load %arg2[%c0_196, %c2_197, %c4_198, %c0_199, %c0_200] : memref<1x4x8x8x8xf32, #tpu.memory_space<vmem>>, vector<1x1x1x8x8xf32>
    %171 = vector.shape_cast %170 : vector<1x1x1x8x8xf32> to vector<8x8xf32>
    %cst_201 = arith.constant dense<0.000000e+00> : vector<8x16xf32>
    %172 = tpu.matmul %171, %1, %cst_201 {dimension_numbers = #tpu.dot_dimension_numbers<[1], [0], [0], [1], [0, 0, 1, 1], [], []>} : vector<8x8xf32>, vector<8x16xf32>, vector<8x16xf32> -> vector<8x16xf32>
    %cst_202 = arith.constant dense<0.000000e+00> : vector<16x16xf32>
    %173 = tpu.matmul %0, %172, %cst_202 {dimension_numbers = #tpu.dot_dimension_numbers<[1], [0], [0], [1], [0, 0, 1, 1], [], []>} : vector<16x8xf32>, vector<8x16xf32>, vector<16x16xf32> -> vector<16x16xf32>
    %c0_203 = arith.constant 0 : index
    %c3_204 = arith.constant 3 : index
    %c4_205 = arith.constant 4 : index
    %c0_206 = arith.constant 0 : index
    %c0_207 = arith.constant 0 : index
    %174 = vector.load %arg2[%c0_203, %c3_204, %c4_205, %c0_206, %c0_207] : memref<1x4x8x8x8xf32, #tpu.memory_space<vmem>>, vector<1x1x1x8x8xf32>
    %175 = vector.shape_cast %174 : vector<1x1x1x8x8xf32> to vector<8x8xf32>
    %cst_208 = arith.constant dense<0.000000e+00> : vector<8x16xf32>
    %176 = tpu.matmul %175, %1, %cst_208 {dimension_numbers = #tpu.dot_dimension_numbers<[1], [0], [0], [1], [0, 0, 1, 1], [], []>} : vector<8x8xf32>, vector<8x16xf32>, vector<8x16xf32> -> vector<8x16xf32>
    %cst_209 = arith.constant dense<0.000000e+00> : vector<16x16xf32>
    %177 = tpu.matmul %0, %176, %cst_209 {dimension_numbers = #tpu.dot_dimension_numbers<[1], [0], [0], [1], [0, 0, 1, 1], [], []>} : vector<16x8xf32>, vector<8x16xf32>, vector<16x16xf32> -> vector<16x16xf32>
    %178 = arith.mulf %165, %3 : vector<16x16xf32>
    %179 = arith.mulf %169, %7 : vector<16x16xf32>
    %180 = arith.addf %178, %179 : vector<16x16xf32>
    %181 = arith.mulf %173, %11 : vector<16x16xf32>
    %182 = arith.addf %180, %181 : vector<16x16xf32>
    %183 = arith.mulf %177, %15 : vector<16x16xf32>
    %184 = arith.addf %182, %183 : vector<16x16xf32>
    %c0_210 = arith.constant 0 : index
    %c4_211 = arith.constant 4 : index
    %c0_212 = arith.constant 0 : index
    %c0_213 = arith.constant 0 : index
    %c0_214 = arith.constant 0 : index
    %185 = vector.load %arg6[%c0_210, %c4_211, %c0_212, %c0_213, %c0_214] : memref<1x8x2x16x16xf32, #tpu.memory_space<vmem>>, vector<1x1x1x16x16xf32>
    %186 = vector.shape_cast %185 : vector<1x1x1x16x16xf32> to vector<16x16xf32>
    %187 = vector.shape_cast %184 : vector<16x16xf32> to vector<1x1x1x16x16xf32>
    tpu.vector_store %arg6[%c0_210, %c4_211, %c0_212, %c0_213, %c0_214], %187 {strides = array<i32>} : memref<1x8x2x16x16xf32, #tpu.memory_space<vmem>>, vector<1x1x1x16x16xf32>,
    %188 = arith.mulf %165, %5 : vector<16x16xf32>
    %189 = arith.mulf %169, %9 : vector<16x16xf32>
    %190 = arith.addf %188, %189 : vector<16x16xf32>
    %191 = arith.mulf %173, %13 : vector<16x16xf32>
    %192 = arith.addf %190, %191 : vector<16x16xf32>
    %193 = arith.mulf %177, %17 : vector<16x16xf32>
    %194 = arith.addf %192, %193 : vector<16x16xf32>
    %c0_215 = arith.constant 0 : index
    %c4_216 = arith.constant 4 : index
    %c1_217 = arith.constant 1 : index
    %c0_218 = arith.constant 0 : index
    %c0_219 = arith.constant 0 : index
    %195 = vector.load %arg6[%c0_215, %c4_216, %c1_217, %c0_218, %c0_219] : memref<1x8x2x16x16xf32, #tpu.memory_space<vmem>>, vector<1x1x1x16x16xf32>
    %196 = vector.shape_cast %195 : vector<1x1x1x16x16xf32> to vector<16x16xf32>
    %197 = vector.shape_cast %194 : vector<16x16xf32> to vector<1x1x1x16x16xf32>
    tpu.vector_store %arg6[%c0_215, %c4_216, %c1_217, %c0_218, %c0_219], %197 {strides = array<i32>} : memref<1x8x2x16x16xf32, #tpu.memory_space<vmem>>, vector<1x1x1x16x16xf32>,
    %c0_220 = arith.constant 0 : index
    %c0_221 = arith.constant 0 : index
    %c5 = arith.constant 5 : index
    %c0_222 = arith.constant 0 : index
    %c0_223 = arith.constant 0 : index
    %198 = vector.load %arg2[%c0_220, %c0_221, %c5, %c0_222, %c0_223] : memref<1x4x8x8x8xf32, #tpu.memory_space<vmem>>, vector<1x1x1x8x8xf32>
    %199 = vector.shape_cast %198 : vector<1x1x1x8x8xf32> to vector<8x8xf32>
    %cst_224 = arith.constant dense<0.000000e+00> : vector<8x16xf32>
    %200 = tpu.matmul %199, %1, %cst_224 {dimension_numbers = #tpu.dot_dimension_numbers<[1], [0], [0], [1], [0, 0, 1, 1], [], []>} : vector<8x8xf32>, vector<8x16xf32>, vector<8x16xf32> -> vector<8x16xf32>
    %cst_225 = arith.constant dense<0.000000e+00> : vector<16x16xf32>
    %201 = tpu.matmul %0, %200, %cst_225 {dimension_numbers = #tpu.dot_dimension_numbers<[1], [0], [0], [1], [0, 0, 1, 1], [], []>} : vector<16x8xf32>, vector<8x16xf32>, vector<16x16xf32> -> vector<16x16xf32>
    %c0_226 = arith.constant 0 : index
    %c1_227 = arith.constant 1 : index
    %c5_228 = arith.constant 5 : index
    %c0_229 = arith.constant 0 : index
    %c0_230 = arith.constant 0 : index
    %202 = vector.load %arg2[%c0_226, %c1_227, %c5_228, %c0_229, %c0_230] : memref<1x4x8x8x8xf32, #tpu.memory_space<vmem>>, vector<1x1x1x8x8xf32>
    %203 = vector.shape_cast %202 : vector<1x1x1x8x8xf32> to vector<8x8xf32>
    %cst_231 = arith.constant dense<0.000000e+00> : vector<8x16xf32>
    %204 = tpu.matmul %203, %1, %cst_231 {dimension_numbers = #tpu.dot_dimension_numbers<[1], [0], [0], [1], [0, 0, 1, 1], [], []>} : vector<8x8xf32>, vector<8x16xf32>, vector<8x16xf32> -> vector<8x16xf32>
    %cst_232 = arith.constant dense<0.000000e+00> : vector<16x16xf32>
    %205 = tpu.matmul %0, %204, %cst_232 {dimension_numbers = #tpu.dot_dimension_numbers<[1], [0], [0], [1], [0, 0, 1, 1], [], []>} : vector<16x8xf32>, vector<8x16xf32>, vector<16x16xf32> -> vector<16x16xf32>
    %c0_233 = arith.constant 0 : index
    %c2_234 = arith.constant 2 : index
    %c5_235 = arith.constant 5 : index
    %c0_236 = arith.constant 0 : index
    %c0_237 = arith.constant 0 : index
    %206 = vector.load %arg2[%c0_233, %c2_234, %c5_235, %c0_236, %c0_237] : memref<1x4x8x8x8xf32, #tpu.memory_space<vmem>>, vector<1x1x1x8x8xf32>
    %207 = vector.shape_cast %206 : vector<1x1x1x8x8xf32> to vector<8x8xf32>
    %cst_238 = arith.constant dense<0.000000e+00> : vector<8x16xf32>
    %208 = tpu.matmul %207, %1, %cst_238 {dimension_numbers = #tpu.dot_dimension_numbers<[1], [0], [0], [1], [0, 0, 1, 1], [], []>} : vector<8x8xf32>, vector<8x16xf32>, vector<8x16xf32> -> vector<8x16xf32>
    %cst_239 = arith.constant dense<0.000000e+00> : vector<16x16xf32>
    %209 = tpu.matmul %0, %208, %cst_239 {dimension_numbers = #tpu.dot_dimension_numbers<[1], [0], [0], [1], [0, 0, 1, 1], [], []>} : vector<16x8xf32>, vector<8x16xf32>, vector<16x16xf32> -> vector<16x16xf32>
    %c0_240 = arith.constant 0 : index
    %c3_241 = arith.constant 3 : index
    %c5_242 = arith.constant 5 : index
    %c0_243 = arith.constant 0 : index
    %c0_244 = arith.constant 0 : index
    %210 = vector.load %arg2[%c0_240, %c3_241, %c5_242, %c0_243, %c0_244] : memref<1x4x8x8x8xf32, #tpu.memory_space<vmem>>, vector<1x1x1x8x8xf32>
    %211 = vector.shape_cast %210 : vector<1x1x1x8x8xf32> to vector<8x8xf32>
    %cst_245 = arith.constant dense<0.000000e+00> : vector<8x16xf32>
    %212 = tpu.matmul %211, %1, %cst_245 {dimension_numbers = #tpu.dot_dimension_numbers<[1], [0], [0], [1], [0, 0, 1, 1], [], []>} : vector<8x8xf32>, vector<8x16xf32>, vector<8x16xf32> -> vector<8x16xf32>
    %cst_246 = arith.constant dense<0.000000e+00> : vector<16x16xf32>
    %213 = tpu.matmul %0, %212, %cst_246 {dimension_numbers = #tpu.dot_dimension_numbers<[1], [0], [0], [1], [0, 0, 1, 1], [], []>} : vector<16x8xf32>, vector<8x16xf32>, vector<16x16xf32> -> vector<16x16xf32>
    %214 = arith.mulf %201, %3 : vector<16x16xf32>
    %215 = arith.mulf %205, %7 : vector<16x16xf32>
    %216 = arith.addf %214, %215 : vector<16x16xf32>
    %217 = arith.mulf %209, %11 : vector<16x16xf32>
    %218 = arith.addf %216, %217 : vector<16x16xf32>
    %219 = arith.mulf %213, %15 : vector<16x16xf32>
    %220 = arith.addf %218, %219 : vector<16x16xf32>
    %c0_247 = arith.constant 0 : index
    %c5_248 = arith.constant 5 : index
    %c0_249 = arith.constant 0 : index
    %c0_250 = arith.constant 0 : index
    %c0_251 = arith.constant 0 : index
    %221 = vector.load %arg6[%c0_247, %c5_248, %c0_249, %c0_250, %c0_251] : memref<1x8x2x16x16xf32, #tpu.memory_space<vmem>>, vector<1x1x1x16x16xf32>
    %222 = vector.shape_cast %221 : vector<1x1x1x16x16xf32> to vector<16x16xf32>
    %223 = vector.shape_cast %220 : vector<16x16xf32> to vector<1x1x1x16x16xf32>
    tpu.vector_store %arg6[%c0_247, %c5_248, %c0_249, %c0_250, %c0_251], %223 {strides = array<i32>} : memref<1x8x2x16x16xf32, #tpu.memory_space<vmem>>, vector<1x1x1x16x16xf32>,
    %224 = arith.mulf %201, %5 : vector<16x16xf32>
    %225 = arith.mulf %205, %9 : vector<16x16xf32>
    %226 = arith.addf %224, %225 : vector<16x16xf32>
    %227 = arith.mulf %209, %13 : vector<16x16xf32>
    %228 = arith.addf %226, %227 : vector<16x16xf32>
    %229 = arith.mulf %213, %17 : vector<16x16xf32>
    %230 = arith.addf %228, %229 : vector<16x16xf32>
    %c0_252 = arith.constant 0 : index
    %c5_253 = arith.constant 5 : index
    %c1_254 = arith.constant 1 : index
    %c0_255 = arith.constant 0 : index
    %c0_256 = arith.constant 0 : index
    %231 = vector.load %arg6[%c0_252, %c5_253, %c1_254, %c0_255, %c0_256] : memref<1x8x2x16x16xf32, #tpu.memory_space<vmem>>, vector<1x1x1x16x16xf32>
    %232 = vector.shape_cast %231 : vector<1x1x1x16x16xf32> to vector<16x16xf32>
    %233 = vector.shape_cast %230 : vector<16x16xf32> to vector<1x1x1x16x16xf32>
    tpu.vector_store %arg6[%c0_252, %c5_253, %c1_254, %c0_255, %c0_256], %233 {strides = array<i32>} : memref<1x8x2x16x16xf32, #tpu.memory_space<vmem>>, vector<1x1x1x16x16xf32>,
    %c0_257 = arith.constant 0 : index
    %c0_258 = arith.constant 0 : index
    %c6 = arith.constant 6 : index
    %c0_259 = arith.constant 0 : index
    %c0_260 = arith.constant 0 : index
    %234 = vector.load %arg2[%c0_257, %c0_258, %c6, %c0_259, %c0_260] : memref<1x4x8x8x8xf32, #tpu.memory_space<vmem>>, vector<1x1x1x8x8xf32>
    %235 = vector.shape_cast %234 : vector<1x1x1x8x8xf32> to vector<8x8xf32>
    %cst_261 = arith.constant dense<0.000000e+00> : vector<8x16xf32>
    %236 = tpu.matmul %235, %1, %cst_261 {dimension_numbers = #tpu.dot_dimension_numbers<[1], [0], [0], [1], [0, 0, 1, 1], [], []>} : vector<8x8xf32>, vector<8x16xf32>, vector<8x16xf32> -> vector<8x16xf32>
    %cst_262 = arith.constant dense<0.000000e+00> : vector<16x16xf32>
    %237 = tpu.matmul %0, %236, %cst_262 {dimension_numbers = #tpu.dot_dimension_numbers<[1], [0], [0], [1], [0, 0, 1, 1], [], []>} : vector<16x8xf32>, vector<8x16xf32>, vector<16x16xf32> -> vector<16x16xf32>
    %c0_263 = arith.constant 0 : index
    %c1_264 = arith.constant 1 : index
    %c6_265 = arith.constant 6 : index
    %c0_266 = arith.constant 0 : index
    %c0_267 = arith.constant 0 : index
    %238 = vector.load %arg2[%c0_263, %c1_264, %c6_265, %c0_266, %c0_267] : memref<1x4x8x8x8xf32, #tpu.memory_space<vmem>>, vector<1x1x1x8x8xf32>
    %239 = vector.shape_cast %238 : vector<1x1x1x8x8xf32> to vector<8x8xf32>
    %cst_268 = arith.constant dense<0.000000e+00> : vector<8x16xf32>
    %240 = tpu.matmul %239, %1, %cst_268 {dimension_numbers = #tpu.dot_dimension_numbers<[1], [0], [0], [1], [0, 0, 1, 1], [], []>} : vector<8x8xf32>, vector<8x16xf32>, vector<8x16xf32> -> vector<8x16xf32>
    %cst_269 = arith.constant dense<0.000000e+00> : vector<16x16xf32>
    %241 = tpu.matmul %0, %240, %cst_269 {dimension_numbers = #tpu.dot_dimension_numbers<[1], [0], [0], [1], [0, 0, 1, 1], [], []>} : vector<16x8xf32>, vector<8x16xf32>, vector<16x16xf32> -> vector<16x16xf32>
    %c0_270 = arith.constant 0 : index
    %c2_271 = arith.constant 2 : index
    %c6_272 = arith.constant 6 : index
    %c0_273 = arith.constant 0 : index
    %c0_274 = arith.constant 0 : index
    %242 = vector.load %arg2[%c0_270, %c2_271, %c6_272, %c0_273, %c0_274] : memref<1x4x8x8x8xf32, #tpu.memory_space<vmem>>, vector<1x1x1x8x8xf32>
    %243 = vector.shape_cast %242 : vector<1x1x1x8x8xf32> to vector<8x8xf32>
    %cst_275 = arith.constant dense<0.000000e+00> : vector<8x16xf32>
    %244 = tpu.matmul %243, %1, %cst_275 {dimension_numbers = #tpu.dot_dimension_numbers<[1], [0], [0], [1], [0, 0, 1, 1], [], []>} : vector<8x8xf32>, vector<8x16xf32>, vector<8x16xf32> -> vector<8x16xf32>
    %cst_276 = arith.constant dense<0.000000e+00> : vector<16x16xf32>
    %245 = tpu.matmul %0, %244, %cst_276 {dimension_numbers = #tpu.dot_dimension_numbers<[1], [0], [0], [1], [0, 0, 1, 1], [], []>} : vector<16x8xf32>, vector<8x16xf32>, vector<16x16xf32> -> vector<16x16xf32>
    %c0_277 = arith.constant 0 : index
    %c3_278 = arith.constant 3 : index
    %c6_279 = arith.constant 6 : index
    %c0_280 = arith.constant 0 : index
    %c0_281 = arith.constant 0 : index
    %246 = vector.load %arg2[%c0_277, %c3_278, %c6_279, %c0_280, %c0_281] : memref<1x4x8x8x8xf32, #tpu.memory_space<vmem>>, vector<1x1x1x8x8xf32>
    %247 = vector.shape_cast %246 : vector<1x1x1x8x8xf32> to vector<8x8xf32>
    %cst_282 = arith.constant dense<0.000000e+00> : vector<8x16xf32>
    %248 = tpu.matmul %247, %1, %cst_282 {dimension_numbers = #tpu.dot_dimension_numbers<[1], [0], [0], [1], [0, 0, 1, 1], [], []>} : vector<8x8xf32>, vector<8x16xf32>, vector<8x16xf32> -> vector<8x16xf32>
    %cst_283 = arith.constant dense<0.000000e+00> : vector<16x16xf32>
    %249 = tpu.matmul %0, %248, %cst_283 {dimension_numbers = #tpu.dot_dimension_numbers<[1], [0], [0], [1], [0, 0, 1, 1], [], []>} : vector<16x8xf32>, vector<8x16xf32>, vector<16x16xf32> -> vector<16x16xf32>
    %250 = arith.mulf %237, %3 : vector<16x16xf32>
    %251 = arith.mulf %241, %7 : vector<16x16xf32>
    %252 = arith.addf %250, %251 : vector<16x16xf32>
    %253 = arith.mulf %245, %11 : vector<16x16xf32>
    %254 = arith.addf %252, %253 : vector<16x16xf32>
    %255 = arith.mulf %249, %15 : vector<16x16xf32>
    %256 = arith.addf %254, %255 : vector<16x16xf32>
    %c0_284 = arith.constant 0 : index
    %c6_285 = arith.constant 6 : index
    %c0_286 = arith.constant 0 : index
    %c0_287 = arith.constant 0 : index
    %c0_288 = arith.constant 0 : index
    %257 = vector.load %arg6[%c0_284, %c6_285, %c0_286, %c0_287, %c0_288] : memref<1x8x2x16x16xf32, #tpu.memory_space<vmem>>, vector<1x1x1x16x16xf32>
    %258 = vector.shape_cast %257 : vector<1x1x1x16x16xf32> to vector<16x16xf32>
    %259 = vector.shape_cast %256 : vector<16x16xf32> to vector<1x1x1x16x16xf32>
    tpu.vector_store %arg6[%c0_284, %c6_285, %c0_286, %c0_287, %c0_288], %259 {strides = array<i32>} : memref<1x8x2x16x16xf32, #tpu.memory_space<vmem>>, vector<1x1x1x16x16xf32>,
    %260 = arith.mulf %237, %5 : vector<16x16xf32>
    %261 = arith.mulf %241, %9 : vector<16x16xf32>
    %262 = arith.addf %260, %261 : vector<16x16xf32>
    %263 = arith.mulf %245, %13 : vector<16x16xf32>
    %264 = arith.addf %262, %263 : vector<16x16xf32>
    %265 = arith.mulf %249, %17 : vector<16x16xf32>
    %266 = arith.addf %264, %265 : vector<16x16xf32>
    %c0_289 = arith.constant 0 : index
    %c6_290 = arith.constant 6 : index
    %c1_291 = arith.constant 1 : index
    %c0_292 = arith.constant 0 : index
    %c0_293 = arith.constant 0 : index
    %267 = vector.load %arg6[%c0_289, %c6_290, %c1_291, %c0_292, %c0_293] : memref<1x8x2x16x16xf32, #tpu.memory_space<vmem>>, vector<1x1x1x16x16xf32>
    %268 = vector.shape_cast %267 : vector<1x1x1x16x16xf32> to vector<16x16xf32>
    %269 = vector.shape_cast %266 : vector<16x16xf32> to vector<1x1x1x16x16xf32>
    tpu.vector_store %arg6[%c0_289, %c6_290, %c1_291, %c0_292, %c0_293], %269 {strides = array<i32>} : memref<1x8x2x16x16xf32, #tpu.memory_space<vmem>>, vector<1x1x1x16x16xf32>,
    %c0_294 = arith.constant 0 : index
    %c0_295 = arith.constant 0 : index
    %c7 = arith.constant 7 : index
    %c0_296 = arith.constant 0 : index
    %c0_297 = arith.constant 0 : index
    %270 = vector.load %arg2[%c0_294, %c0_295, %c7, %c0_296, %c0_297] : memref<1x4x8x8x8xf32, #tpu.memory_space<vmem>>, vector<1x1x1x8x8xf32>
    %271 = vector.shape_cast %270 : vector<1x1x1x8x8xf32> to vector<8x8xf32>
    %cst_298 = arith.constant dense<0.000000e+00> : vector<8x16xf32>
    %272 = tpu.matmul %271, %1, %cst_298 {dimension_numbers = #tpu.dot_dimension_numbers<[1], [0], [0], [1], [0, 0, 1, 1], [], []>} : vector<8x8xf32>, vector<8x16xf32>, vector<8x16xf32> -> vector<8x16xf32>
    %cst_299 = arith.constant dense<0.000000e+00> : vector<16x16xf32>
    %273 = tpu.matmul %0, %272, %cst_299 {dimension_numbers = #tpu.dot_dimension_numbers<[1], [0], [0], [1], [0, 0, 1, 1], [], []>} : vector<16x8xf32>, vector<8x16xf32>, vector<16x16xf32> -> vector<16x16xf32>
    %c0_300 = arith.constant 0 : index
    %c1_301 = arith.constant 1 : index
    %c7_302 = arith.constant 7 : index
    %c0_303 = arith.constant 0 : index
    %c0_304 = arith.constant 0 : index
    %274 = vector.load %arg2[%c0_300, %c1_301, %c7_302, %c0_303, %c0_304] : memref<1x4x8x8x8xf32, #tpu.memory_space<vmem>>, vector<1x1x1x8x8xf32>
    %275 = vector.shape_cast %274 : vector<1x1x1x8x8xf32> to vector<8x8xf32>
    %cst_305 = arith.constant dense<0.000000e+00> : vector<8x16xf32>
    %276 = tpu.matmul %275, %1, %cst_305 {dimension_numbers = #tpu.dot_dimension_numbers<[1], [0], [0], [1], [0, 0, 1, 1], [], []>} : vector<8x8xf32>, vector<8x16xf32>, vector<8x16xf32> -> vector<8x16xf32>
    %cst_306 = arith.constant dense<0.000000e+00> : vector<16x16xf32>
    %277 = tpu.matmul %0, %276, %cst_306 {dimension_numbers = #tpu.dot_dimension_numbers<[1], [0], [0], [1], [0, 0, 1, 1], [], []>} : vector<16x8xf32>, vector<8x16xf32>, vector<16x16xf32> -> vector<16x16xf32>
    %c0_307 = arith.constant 0 : index
    %c2_308 = arith.constant 2 : index
    %c7_309 = arith.constant 7 : index
    %c0_310 = arith.constant 0 : index
    %c0_311 = arith.constant 0 : index
    %278 = vector.load %arg2[%c0_307, %c2_308, %c7_309, %c0_310, %c0_311] : memref<1x4x8x8x8xf32, #tpu.memory_space<vmem>>, vector<1x1x1x8x8xf32>
    %279 = vector.shape_cast %278 : vector<1x1x1x8x8xf32> to vector<8x8xf32>
    %cst_312 = arith.constant dense<0.000000e+00> : vector<8x16xf32>
    %280 = tpu.matmul %279, %1, %cst_312 {dimension_numbers = #tpu.dot_dimension_numbers<[1], [0], [0], [1], [0, 0, 1, 1], [], []>} : vector<8x8xf32>, vector<8x16xf32>, vector<8x16xf32> -> vector<8x16xf32>
    %cst_313 = arith.constant dense<0.000000e+00> : vector<16x16xf32>
    %281 = tpu.matmul %0, %280, %cst_313 {dimension_numbers = #tpu.dot_dimension_numbers<[1], [0], [0], [1], [0, 0, 1, 1], [], []>} : vector<16x8xf32>, vector<8x16xf32>, vector<16x16xf32> -> vector<16x16xf32>
    %c0_314 = arith.constant 0 : index
    %c3_315 = arith.constant 3 : index
    %c7_316 = arith.constant 7 : index
    %c0_317 = arith.constant 0 : index
    %c0_318 = arith.constant 0 : index
    %282 = vector.load %arg2[%c0_314, %c3_315, %c7_316, %c0_317, %c0_318] : memref<1x4x8x8x8xf32, #tpu.memory_space<vmem>>, vector<1x1x1x8x8xf32>
    %283 = vector.shape_cast %282 : vector<1x1x1x8x8xf32> to vector<8x8xf32>
    %cst_319 = arith.constant dense<0.000000e+00> : vector<8x16xf32>
    %284 = tpu.matmul %283, %1, %cst_319 {dimension_numbers = #tpu.dot_dimension_numbers<[1], [0], [0], [1], [0, 0, 1, 1], [], []>} : vector<8x8xf32>, vector<8x16xf32>, vector<8x16xf32> -> vector<8x16xf32>
    %cst_320 = arith.constant dense<0.000000e+00> : vector<16x16xf32>
    %285 = tpu.matmul %0, %284, %cst_320 {dimension_numbers = #tpu.dot_dimension_numbers<[1], [0], [0], [1], [0, 0, 1, 1], [], []>} : vector<16x8xf32>, vector<8x16xf32>, vector<16x16xf32> -> vector<16x16xf32>
    %286 = arith.mulf %273, %3 : vector<16x16xf32>
    %287 = arith.mulf %277, %7 : vector<16x16xf32>
    %288 = arith.addf %286, %287 : vector<16x16xf32>
    %289 = arith.mulf %281, %11 : vector<16x16xf32>
    %290 = arith.addf %288, %289 : vector<16x16xf32>
    %291 = arith.mulf %285, %15 : vector<16x16xf32>
    %292 = arith.addf %290, %291 : vector<16x16xf32>
    %c0_321 = arith.constant 0 : index
    %c7_322 = arith.constant 7 : index
    %c0_323 = arith.constant 0 : index
    %c0_324 = arith.constant 0 : index
    %c0_325 = arith.constant 0 : index
    %293 = vector.load %arg6[%c0_321, %c7_322, %c0_323, %c0_324, %c0_325] : memref<1x8x2x16x16xf32, #tpu.memory_space<vmem>>, vector<1x1x1x16x16xf32>
    %294 = vector.shape_cast %293 : vector<1x1x1x16x16xf32> to vector<16x16xf32>
    %295 = vector.shape_cast %292 : vector<16x16xf32> to vector<1x1x1x16x16xf32>
    tpu.vector_store %arg6[%c0_321, %c7_322, %c0_323, %c0_324, %c0_325], %295 {strides = array<i32>} : memref<1x8x2x16x16xf32, #tpu.memory_space<vmem>>, vector<1x1x1x16x16xf32>,
    %296 = arith.mulf %273, %5 : vector<16x16xf32>
    %297 = arith.mulf %277, %9 : vector<16x16xf32>
    %298 = arith.addf %296, %297 : vector<16x16xf32>
    %299 = arith.mulf %281, %13 : vector<16x16xf32>
    %300 = arith.addf %298, %299 : vector<16x16xf32>
    %301 = arith.mulf %285, %17 : vector<16x16xf32>
    %302 = arith.addf %300, %301 : vector<16x16xf32>
    %c0_326 = arith.constant 0 : index
    %c7_327 = arith.constant 7 : index
    %c1_328 = arith.constant 1 : index
    %c0_329 = arith.constant 0 : index
    %c0_330 = arith.constant 0 : index
    %303 = vector.load %arg6[%c0_326, %c7_327, %c1_328, %c0_329, %c0_330] : memref<1x8x2x16x16xf32, #tpu.memory_space<vmem>>, vector<1x1x1x16x16xf32>
    %304 = vector.shape_cast %303 : vector<1x1x1x16x16xf32> to vector<16x16xf32>
    %305 = vector.shape_cast %302 : vector<16x16xf32> to vector<1x1x1x16x16xf32>
    tpu.vector_store %arg6[%c0_326, %c7_327, %c1_328, %c0_329, %c0_330], %305 {strides = array<i32>} : memref<1x8x2x16x16xf32, #tpu.memory_space<vmem>>, vector<1x1x1x16x16xf32>,
    return
  }
  func.func @transform_0(%arg0: i32, %arg1: i32) -> (i32, i32, i32, i32, i32) {
    %c0_i32 = arith.constant 0 : i32
    %c0_i32_0 = arith.constant 0 : i32
    %c0_i32_1 = arith.constant 0 : i32
    %c0_i32_2 = arith.constant 0 : i32
    return %arg0, %c0_i32, %arg1, %c0_i32_0, %c0_i32_1 : i32, i32, i32, i32, i32
  }
  func.func @transform_1(%arg0: i32, %arg1: i32) -> (i32, i32, i32, i32) {
    %c0_i32 = arith.constant 0 : i32
    %c0_i32_0 = arith.constant 0 : i32
    %c0_i32_1 = arith.constant 0 : i32
    %c0_i32_2 = arith.constant 0 : i32
    %c0_i32_3 = arith.constant 0 : i32
    return %c0_i32, %c0_i32_0, %c0_i32_1, %c0_i32_2 : i32, i32, i32, i32
  }
  func.func @transform_2(%arg0: i32, %arg1: i32) -> (i32, i32) {
    %c0_i32 = arith.constant 0 : i32
    %c0_i32_0 = arith.constant 0 : i32
    %c0_i32_1 = arith.constant 0 : i32
    return %c0_i32, %c0_i32_0 : i32, i32
  }
  func.func @transform_3(%arg0: i32, %arg1: i32) -> (i32, i32) {
    %c0_i32 = arith.constant 0 : i32
    %c0_i32_0 = arith.constant 0 : i32
    %c0_i32_1 = arith.constant 0 : i32
    return %c0_i32, %c0_i32_0 : i32, i32
  }
  func.func @transform_4(%arg0: i32, %arg1: i32) -> (i32, i32, i32, i32, i32) {
    %c0_i32 = arith.constant 0 : i32
    %c0_i32_0 = arith.constant 0 : i32
    %c0_i32_1 = arith.constant 0 : i32
    %c0_i32_2 = arith.constant 0 : i32
    return %arg0, %arg1, %c0_i32, %c0_i32_0, %c0_i32_1 : i32, i32, i32, i32, i32
  }
}

</mosaic_0001>

<bundles_post_ra>
// kernel: tpu_custom_call.1
= control target key start
LH: loop header
LB: loop body
LE: loop exit
PB: predicated region body
PF: predicated region fallthrough
CT: control target
= control target key end

     0   :  { %9 = vsyncpa [#allocation3], 0  ;;  %s7177_s0 = inlined_call_operand.hbm [shape: f32[2,4,8,8,8], index: 0, kind: input, shape index: {}]   ;;  %s7178_s1 = inlined_call_operand.hbm [shape: f32[4,2,16,16], index: 1, kind: input, shape index: {}]   ;;  %s7179_s2 = inlined_call_operand.vmem [shape: f32[16,8], index: 2, kind: input, shape index: {}]   ;;  %s7180_s3 = inlined_call_operand.vmem [shape: f32[8,16], index: 3, kind: input, shape index: {}]   ;;  %s7181_s4 = inlined_call_operand.hbm [shape: f32[2,8,2,16,16], index: 4, kind: output, shape index: {}]  }
   0x1   :  { %11 = vsyncpa [#allocation3 + $0x1], 0 }
   0x2   :  { %12 = vsyncpa [#allocation6], 0 }
   0x3   :  { %13 = vsyncpa [#allocation4], 0 }
   0x4   :  { %15 = vsyncpa [#allocation4 + $0x1], 0  ;;  %s6384_s15 = smov 0   ;;  %s6386_s16 = smov 0  }
   0x5   :  { %s6388_s17 = smov 0   ;;  %s6390_s18 = smov 0  }
   0x6   :  { %s6392_s19 = smov 0   ;;  %s6394_s20 = smov 0  }
   0x7 LB: > { %s5469_s21 = sadd.s32 4294967295, %s6348_s20   ;;  %s5470_s22 = sadd.s32 4294967294, %s6348_s20   ;;  %s6348_s20 = sphi %s6394_s20, %s21_s20   ;;  %s6344_s19 = sphi %s6392_s19, %s7205_s19   ;;  %s6340_s18 = sphi %s6390_s18, %s7204_s18   ;;  %s6336_s17 = sphi %s6388_s17, %s7203_s17   ;;  %s6332_s16 = sphi %s6386_s16, %s7202_s16   ;;  %s6328_s15 = sphi %s6384_s15, %s7201_s15  }
   0x8   : > { %p55_p0 = scmp.ne.s32.totalorder %s6332_s16, %s6328_s15  ;;  %p6418_p1 = scmp.eq.s32.totalorder %s5469_s21, 0 }
   0x9   : > { %p6422_p2 = scmp.eq.s32.totalorder %s5469_s21, 1  ;;  %p150_p3 = scmp.eq.s32.totalorder %s5470_s22, 1 }
   0xa   : > { %s7186_s23 = scalar_select %p6418_p1, 1, 0 }
   0xb   : > { %s7187_s24 = scalar_select %p6422_p2, 1, 0 }
   0xc   : > { %p6428_p4 = por %p6418_p1, %p55_p0  ;;  %p5471_p5 = scmp.ge.s32.totalorder %s6348_s20, 1 }
   0xd   : > { %p6433_p6 = por %p150_p3, %p55_p0  ;;  %p157_p7 = scmp.lt.s32.totalorder %s6348_s20, 3 }
   0xe   : > { %s7188_s25 = scalar_select %p6428_p4, 1, 0 }
   0xf   : > { %s7189_s26 = scalar_select %p6433_p6, 1, 0 }
  0x10   : > { %p6438_p8 = pnand %p5471_p5, %p157_p7  ;;  %s6350_s28 = smov [#allocation5]  }
  0x11   : > { %s169_s29 = sshll.u32 %s6350_s28, 4  ;;  %s33_s5 = sadd.s32 1, %s6344_s19  ;;  %s170_s29 = int_to_ptr.vmem [resolvable:$true] %s169_s29 }
  0x12   : > { %s7190_s27 = scalar_select %p6438_p8, 1, 0 }
  0x13   : > { %p6133_p9 = pneg %p6438_p8  ;;  %s6204_s8 = scalar_lea.hbm %s7178_s1, 2048 }
  0x14   : > { %p6205_p12 = scmp.ne.s32.totalorder %s7178_s1, %s6204_s8  ;;  %p6211_p5 = scmp.lt.u32.totalorder %s6204_s8, %s7178_s1 }
  0x15   : > { %p6447_p11 = pnand %p6133_p9, %p6418_p1 }
  0x17   : > { %p6206_p13 = pneg %p6447_p11 }
  0x19   : > { %p6207_p0 = pnand %p6206_p13, %p6205_p12 }
  0x1b   : > { %p6208_p3 = pneg %p6207_p0 }
  0x1d   : > { %p6213_p7 = pnand %p6211_p5, %p6208_p3 }
  0x1f   : > { %6216 = shalt.err (!%p6213_p7)
}
  0x20   : > { %s6217_s13 = scalar_lea.vmem %s170_s29, 2048  ;;  %p6225_p1 = scmp.lt.s32.totalorder %s170_s29, %s170_s29 }
  0x21   : > { %p6218_p9 = scmp.ne.s32.totalorder %s170_s29, %s6217_s13  ;;  %p6226_p4 = scmp.lt.s32.totalorder %s6217_s13, %s6217_s13 }
  0x23   : > { %p6220_p10 = pnand %p6218_p9, %p6206_p13  ;;  %p6227_p8 = por %p6226_p4, %p6225_p1 }
  0x25   : > { %p6221_p6 = pneg %p6220_p10 }
  0x27   : > { %p6228_p2 = pnand %p6227_p8, %p6221_p6 }
  0x29   : > { %6231 = shalt.err (!%p6228_p2)
}
  0x2a   : > { %s6351_s14 = smov 128   ;;  %s6352_s21 = smov 8  }
  0x2b   : > { %6136 = dma.hbm_to_vmem [thread:$0]  (!%p6447_p11), %s7178_s1, 2048, %s170_s29, [#allocation6], %s6351_s14, %s6351_s14, %s6352_s21  }
  0x2c   : > { %p35_p1 = scmp.ge.s32.totalorder %s33_s5, 2  ;;  %s42_s6 = sadd.s32 1, %s6336_s17 }
  0x2d   : > { %p49_p2 = scmp.ne.s32.totalorder %s6336_s17, %s6332_s16  ;;  %p50_p4 = scmp.eq.s32.totalorder %s6348_s20, 0 }
  0x2e   : > { %s7207_s5 = smov (%p35_p1, %s33_s5), 0  ;;  %p7193_p8 = scmp.ne.s32.totalorder %s7187_s24, 0 }
  0x2f   : > { %p6477_p6 = por %p50_p4, %p49_p2  ;;  %s37_s8 = ssub.s32 %s6344_s19, %s7207_s5 }
  0x30   : > { %p6483_p10 = por %p7193_p8, %p49_p2  ;;  %p6146_p12 = scmp.lt.s32.totalorder %s6348_s20, 2 }
  0x31   : > { %p40_p11 = scmp.eq.s32.totalorder %s37_s8, 0  ;;  %s189_s29 = sand.u32 1, %s6336_s17  }
  0x32   : > { %s5474_s9 = sshll.u32 %s189_s29, 8  ;;  %s5643_s11 = sshll.u32 %s6344_s19, 12 }
  0x33   : > { %s6492_s10 = scalar_select %p40_p11, %s6336_s17, %s42_s6  }
  0x34   : > { %s6498_s22 = scalar_lea.hbm %s7177_s0, %s5643_s11  ;;  %s193_s24 = scalar_lea.vmem [#allocation2], %s5474_s9 }
  0x35   : > { %s202_s28 = sshll.u32 %s193_s24, 4  ;;  %p6504_p13 = pnand %p6146_p12, %p6477_p6  ;;  %s6500_s28 = int_to_ptr.vmem [resolvable:$true] %s202_s28 }
  0x36   : > { %s6508_s6 = scalar_lea.sflag [#allocation3], %s189_s29  ;;  %s6232_s12 = scalar_lea.hbm %s6498_s22, 4096 }
  0x37   : > { %p6233_p0 = scmp.ne.s32.totalorder %s6498_s22, %s6232_s12  ;;  %p6234_p3 = pneg %p6504_p13 }
  0x38   : > { %s6237_s7 = scalar_lea.hbm %s7177_s0, 8192  ;;  %p6238_p9 = scmp.lt.u32.totalorder %s6498_s22, %s7177_s0 }
  0x39   : > { %p6235_p5 = pnand %p6234_p3, %p6233_p0  ;;  %p6239_p1 = scmp.lt.u32.totalorder %s6237_s7, %s6232_s12 }
  0x3a   : > { %p6241_p4 = scmp.lt.u32.totalorder %s6232_s12, %s6498_s22 }
  0x3b   : > { %p6236_p7 = pneg %p6235_p5  ;;  %p6240_p2 = por %p6239_p1, %p6238_p9 }
  0x3d   : > { %p6242_p6 = por %p6241_p4, %p6240_p2 }
  0x3f   : > { %p6243_p8 = pnand %p6242_p6, %p6236_p7 }
  0x41   : > { %6246 = shalt.err (!%p6243_p8)
}
  0x42   : > { %s6247_s29 = scalar_lea.vmem %s6500_s28, 4096  ;;  %s6353_s9 = smov [#allocation2]  }
  0x43   : > { %p6248_p12 = scmp.ne.s32.totalorder %s6500_s28, %s6247_s29  ;;  %s6252_s11 = sshll.u32 %s6353_s9, 4  ;;  %s6253_s11 = int_to_ptr.vmem [resolvable:$false] %s6252_s11 }
  0x44   : > { %s6254_s13 = scalar_lea.vmem %s6253_s11, 8192  ;;  %p6255_p5 = scmp.lt.s32.totalorder %s6500_s28, %s6253_s11 }
  0x45   : > { %p6250_p11 = pnand %p6248_p12, %p6234_p3  ;;  %p6256_p9 = scmp.lt.s32.totalorder %s6254_s13, %s6247_s29 }
  0x47   : > { %p6251_p0 = pneg %p6250_p11  ;;  %p6257_p1 = por %p6256_p9, %p6255_p5 }
  0x49   : > { %p6258_p2 = pnand %p6257_p1, %p6251_p0 }
  0x4b   : > { %6261 = shalt.err (!%p6258_p2)
}
  0x4c   : > { %6140 = dma.hbm_to_vmem [thread:$0]  (!%p6504_p13), %s6498_s22, 4096, %s6500_s28, %s6508_s6, %s6351_s14, %s6351_s14, %s6352_s21  }
  0x4d   : > { %p7196_p3 = scmp.ne.s32.totalorder %s7190_s27, 0 }
  0x4e   : > { %s6542_s12 = sand.u32 (!%p7196_p3), 1, %s6332_s16   ;;  %p7197_p7 = scmp.ne.s32.totalorder (!%p7196_p3), %s7188_s25, 0 }
  0x4f   : > { %214 = sbr.rel (%p7196_p3) target bundleno = 663 (0x297), region = 36  ;;  %s5478_s7 = sshll.u32 (!%p7196_p3), %s6542_s12, 8 }
  0x50   : > { %s217_s24 = scalar_lea.sflag (!%p7196_p3), [#allocation3], %s6542_s12  ;;  %s6548_s8 = scalar_lea.vmem (!%p7196_p3), [#allocation2], %s5478_s7 }
  0x56   : > { %6315 = dma.done.wait (%p7197_p7), %s217_s24, 4096  }
  0x57   : > { %6317 = vsyncadd (%p7197_p7), %s217_s24, 4294963200  ;;  %p7198_p13 = scmp.ne.s32.totalorder %s7186_s23, 0 }
  0x59   : > { %6319 = dma.done.wait (%p7198_p13), [#allocation6], 2048  }
  0x5a   : > { %6321 = vsyncadd (%p7198_p13), [#allocation6], 4294965248  ;;  %v6354_v0 = vmov 0.0   ;;  %vm6355_vm0 = vmmov 0   ;;  %vm278_vm1 = vcmask 64512   ;;  %v6564_v1 = vld [vmem:[%s7180_s3] sm:$0xff] }
  0x5b   : > { %5805 = vmatprep.subr.mxu0 %v6354_v0  ;;  %5807 = vmatprep.mubr.msk.f32.mxu0 %vm6355_vm0, %v6354_v0  ;;  %v277_v2 = vld [vmem:[%s6548_s8] sm:$0xff]  ;;  %v5498_v6 = vld [vmem:[%s6548_s8 + $0x8] sm:$0xff]  ;;  %v5518_v10 = vld [vmem:[%s6548_s8 + $0x10] sm:$0xff]  ;;  %vm897_vm2 = vcmask 130048   ;;  %s6943_s28 = scalar_lea.vmem [#allocation7], %s5478_s7  ;;  %s5644_s6 = sshll.u32 %s6340_s18, 12 }
  0x5c   : > { %5806 = vmatpush3.msra.mxu0 %v6564_v1  ;;  %v5484_v3 = vld [vmem:[%s6548_s8 + $0x40] sm:$0xff]  ;;  %v5502_v7 = vld [vmem:[%s6548_s8 + $0x48] sm:$0xff]  ;;  %v5522_v11 = vld [vmem:[%s6548_s8 + $0x50] sm:$0xff]  ;;  %s5372_s29 = sshll.u32 %s6943_s28, 4  ;;  %s7118_s13 = scalar_lea.hbm %s7181_s4, %s5644_s6  ;;  %s7120_s29 = int_to_ptr.vmem [resolvable:$true] %s5372_s29 }
  0x5d   : > { %5808 = vmatmul.mubr.msk.f32.vlgmr.msra.gmra.mrb[0].mxu0 %vm278_vm1, %v277_v2  ;;  %5815 = vmatprep.subr.mxu0 %v6354_v0  ;;  %v5488_v4 = vld [vmem:[%s6548_s8 + $0x80] sm:$0xff]  ;;  %v5506_v8 = vld [vmem:[%s6548_s8 + $0x88] sm:$0xff]  ;;  %v5526_v12 = vld [vmem:[%s6548_s8 + $0x90] sm:$0xff]  ;;  %s5356_s18 = scalar_lea.sflag [#allocation4], %s6542_s12  ;;  %s6262_s7 = scalar_lea.vmem %s7120_s29, 4096 }
  0x5e   : > { %5816 = vmatpush3.msra.mxu0 %v6564_v1  ;;  %5817 = vmatprep.mubr.msk.f32.mxu0 %vm6355_vm0, %v6354_v0  ;;  %v5492_v5 = vld [vmem:[%s6548_s8 + $0xc0] sm:$0xff]  ;;  %v5510_v9 = vld [vmem:[%s6548_s8 + $0xc8] sm:$0xff]  ;;  %v5530_v13 = vld [vmem:[%s6548_s8 + $0xd0] sm:$0xff]  ;;  %p6263_p4 = scmp.ne.s32.totalorder %s7120_s29, %s6262_s7  ;;  %s6356_s24 = smov [#allocation7]  }
  0x5f   : > { %5825 = vmatprep.subr.mxu0 %v6354_v0  ;;  %v5538_v14 = vld [vmem:[%s6548_s8 + $0x18] sm:$0xff]  ;;  %v5558_v18 = vld [vmem:[%s6548_s8 + $0x20] sm:$0xff]  ;;  %v5578_v22 = vld [vmem:[%s6548_s8 + $0x28] sm:$0xff] }
  0x60   : > { %v5542_v15 = vld [vmem:[%s6548_s8 + $0x58] sm:$0xff]  ;;  %v5562_v19 = vld [vmem:[%s6548_s8 + $0x60] sm:$0xff]  ;;  %v5582_v23 = vld [vmem:[%s6548_s8 + $0x68] sm:$0xff]  ;;  %p6264_p6 = pnand %p6263_p4, %p6483_p10 }
  0x61   : > { %5818 = vmatmul.mubr.msk.f32.vlgmr.msra.gmra.mrb[2].mxu0 %vm278_vm1, %v5484_v3  ;;  %v5546_v16 = vld [vmem:[%s6548_s8 + $0x98] sm:$0xff]  ;;  %v5566_v20 = vld [vmem:[%s6548_s8 + $0xa0] sm:$0xff]  ;;  %v5586_v25 = vld [vmem:[%s6548_s8 + $0xa8] sm:$0xff] }
  0x62   : > { %5826 = vmatpush3.msra.mxu0 %v6564_v1  ;;  %5827 = vmatprep.mubr.msk.f32.mxu0 %vm6355_vm0, %v6354_v0  ;;  %v5550_v17 = vld [vmem:[%s6548_s8 + $0xd8] sm:$0xff]  ;;  %v5570_v21 = vld [vmem:[%s6548_s8 + $0xe0] sm:$0xff]  ;;  %v5590_v26 = vld [vmem:[%s6548_s8 + $0xe8] sm:$0xff]  ;;  %p6265_p8 = pneg %p6264_p6 }
  0x63   : > { %5835 = vmatprep.subr.mxu0 %v6354_v0  ;;  %v6699_v24 = vld [vmem:[%s7179_s2] sm:$0xff]  ;;  %v5598_v27 = vld [vmem:[%s6548_s8 + $0x30] sm:$0xff]  ;;  %v5618_v31 = vld [vmem:[%s6548_s8 + $0x38] sm:$0xff] }
  0x64   : > { %5812 = vmatprep.mubr.msk.f32.mxu1 %vm278_vm1, %v6699_v24  ;;  %v5602_v28 = vld [vmem:[%s6548_s8 + $0x70] sm:$0xff]  ;;  %v5622_v32 = vld [vmem:[%s6548_s8 + $0x78] sm:$0xff]  ;;  %v6765_v36 = vld [vmem:[%s7179_s2 + $0x8] sm:$0xff] }
  0x65   : > { %5828 = vmatmul.mubr.msk.f32.vlgmr.msra.gmra.mrb[4].mxu0 %vm278_vm1, %v5488_v4  ;;  %v5606_v29 = vld [vmem:[%s6548_s8 + $0xb0] sm:$0xff]  ;;  %v5626_v33 = vld [vmem:[%s6548_s8 + $0xb8] sm:$0xff] }
  0x66   : > { %5836 = vmatpush3.msra.mxu0 %v6564_v1  ;;  %5837 = vmatprep.mubr.msk.f32.mxu0 %vm6355_vm0, %v6354_v0  ;;  %v5610_v30 = vld [vmem:[%s6548_s8 + $0xf0] sm:$0xff]  ;;  %v5630_v34 = vld [vmem:[%s6548_s8 + $0xf8] sm:$0xff]  ;;  %s6266_s8 = sshll.u32 %s6356_s24, 4  ;;  %s6267_s8 = int_to_ptr.vmem [resolvable:$false] %s6266_s8 }
  0x67   : > { %5845 = vmatprep.subr.mxu0 %v6354_v0  ;;  %s6268_s27 = scalar_lea.vmem %s6267_s8, 8192  ;;  %p6269_p12 = scmp.lt.s32.totalorder %s7120_s29, %s6267_s8 }
  0x68   : > { %p6270_p11 = scmp.lt.s32.totalorder %s6268_s27, %s6262_s7 }
  0x69   : > { %5838 = vmatmul.mubr.msk.f32.vlgmr.msra.gmra.mrb[6].mxu0 %vm278_vm1, %v5492_v5 }
  0x6a   : > { %5846 = vmatpush3.msra.mxu0 %v6564_v1  ;;  %5847 = vmatprep.mubr.msk.f32.mxu0 %vm6355_vm0, %v6354_v0  ;;  %p6271_p0 = por %p6270_p11, %p6269_p12 }
  0x6b   : > { %5855 = vmatprep.subr.mxu0 %v6354_v0 }
  0x6c   : > { %p6272_p5 = pnand %p6271_p0, %p6265_p8 }
  0x6d   : > { %5848 = vmatmul.mubr.msk.f32.vlgmr.msra.gmra.mrb[8].mxu0 %vm278_vm1, %v5498_v6 }
  0x6e   : > { %5856 = vmatpush3.msra.mxu0 %v6564_v1  ;;  %5857 = vmatprep.mubr.msk.f32.mxu0 %vm6355_vm0, %v6354_v0 }
  0x6f   : > { %5865 = vmatprep.subr.mxu0 %v6354_v0 }
  0x71   : > { %5858 = vmatmul.mubr.msk.f32.vlgmr.msra.gmra.mrb[10].mxu0 %vm278_vm1, %v5502_v7 }
  0x72   : > { %5866 = vmatpush3.msra.mxu0 %v6564_v1  ;;  %5867 = vmatprep.mubr.msk.f32.mxu0 %vm6355_vm0, %v6354_v0 }
  0x73   : > { %5875 = vmatprep.subr.mxu0 %v6354_v0 }
  0x75   : > { %5868 = vmatmul.mubr.msk.f32.vlgmr.msra.gmra.mrb[12].mxu0 %vm278_vm1, %v5506_v8 }
  0x76   : > { %5876 = vmatpush3.msra.mxu0 %v6564_v1  ;;  %5877 = vmatprep.mubr.msk.f32.mxu0 %vm6355_vm0, %v6354_v0 }
  0x77   : > { %5885 = vmatprep.subr.mxu0 %v6354_v0 }
  0x79   : > { %5878 = vmatmul.mubr.msk.f32.vlgmr.msra.gmra.mrb[14].mxu0 %vm278_vm1, %v5510_v9 }
  0x7a   : > { %5886 = vmatpush3.msra.mxu0 %v6564_v1  ;;  %5887 = vmatprep.mubr.msk.f32.mxu0 %vm6355_vm0, %v6354_v0 }
  0x7b   : > { %5895 = vmatprep.subr.mxu0 %v6354_v0 }
  0x7d   : > { %5888 = vmatmul.mubr.msk.f32.vlgmr.msra.gmra.mrb[16].mxu0 %vm278_vm1, %v5518_v10 }
  0x7e   : > { %5896 = vmatpush3.msra.mxu0 %v6564_v1  ;;  %5897 = vmatprep.mubr.msk.f32.mxu0 %vm6355_vm0, %v6354_v0 }
  0x7f   : > { %5905 = vmatprep.subr.mxu0 %v6354_v0 }
  0x81   : > { %5898 = vmatmul.mubr.msk.f32.vlgmr.msra.gmra.mrb[18].mxu0 %vm278_vm1, %v5522_v11 }
  0x82   : > { %5906 = vmatpush3.msra.mxu0 %v6564_v1  ;;  %5907 = vmatprep.mubr.msk.f32.mxu0 %vm6355_vm0, %v6354_v0 }
  0x83   : > { %5915 = vmatprep.subr.mxu0 %v6354_v0 }
  0x85   : > { %5908 = vmatmul.mubr.msk.f32.vlgmr.msra.gmra.mrb[20].mxu0 %vm278_vm1, %v5526_v12 }
  0x86   : > { %5916 = vmatpush3.msra.mxu0 %v6564_v1  ;;  %5917 = vmatprep.mubr.msk.f32.mxu0 %vm6355_vm0, %v6354_v0 }
  0x87   : > { %5925 = vmatprep.subr.mxu0 %v6354_v0 }
  0x89   : > { %5918 = vmatmul.mubr.msk.f32.vlgmr.msra.gmra.mrb[22].mxu0 %vm278_vm1, %v5530_v13 }
  0x8a   : > { %5926 = vmatpush3.msra.mxu0 %v6564_v1  ;;  %5927 = vmatprep.mubr.msk.f32.mxu0 %vm6355_vm0, %v6354_v0 }
  0x8b   : > { %5935 = vmatprep.subr.mxu0 %v6354_v0 }
  0x8d   : > { %5928 = vmatmul.mubr.msk.f32.vlgmr.msra.gmra.mrb[24].mxu0 %vm278_vm1, %v5538_v14 }
  0x8e   : > { %5936 = vmatpush3.msra.mxu0 %v6564_v1  ;;  %5937 = vmatprep.mubr.msk.f32.mxu0 %vm6355_vm0, %v6354_v0 }
  0x8f   : > { %5945 = vmatprep.subr.mxu0 %v6354_v0 }
  0x91   : > { %5938 = vmatmul.mubr.msk.f32.vlgmr.msra.gmra.mrb[26].mxu0 %vm278_vm1, %v5542_v15 }
  0x92   : > { %5946 = vmatpush3.msra.mxu0 %v6564_v1  ;;  %5947 = vmatprep.mubr.msk.f32.mxu0 %vm6355_vm0, %v6354_v0 }
  0x93   : > { %5955 = vmatprep.subr.mxu0 %v6354_v0 }
  0x95   : > { %5948 = vmatmul.mubr.msk.f32.vlgmr.msra.gmra.mrb[28].mxu0 %vm278_vm1, %v5546_v16 }
  0x96   : > { %5956 = vmatpush3.msra.mxu0 %v6564_v1  ;;  %5957 = vmatprep.mubr.msk.f32.mxu0 %vm6355_vm0, %v6354_v0 }
  0x97   : > { %5965 = vmatprep.subr.mxu0 %v6354_v0 }
  0x99   : > { %5958 = vmatmul.mubr.msk.f32.vlgmr.msra.gmra.mrb[30].mxu0 %vm278_vm1, %v5550_v17 }
  0x9a   : > { %5966 = vmatpush3.msra.mxu0 %v6564_v1  ;;  %5967 = vmatprep.mubr.msk.f32.mxu0 %vm6355_vm0, %v6354_v0 }
  0x9b   : > { %5975 = vmatprep.subr.mxu0 %v6354_v0 }
  0x9d   : > { %5968 = vmatmul.mubr.msk.f32.vlgmr.msra.gmra.mrb[32].mxu0 %vm278_vm1, %v5558_v18 }
  0x9e   : > { %5976 = vmatpush3.msra.mxu0 %v6564_v1  ;;  %5977 = vmatprep.mubr.msk.f32.mxu0 %vm6355_vm0, %v6354_v0 }
  0x9f   : > { %5985 = vmatprep.subr.mxu0 %v6354_v0 }
  0xa1   : > { %5978 = vmatmul.mubr.msk.f32.vlgmr.msra.gmra.mrb[34].mxu0 %vm278_vm1, %v5562_v19 }
  0xa2   : > { %5986 = vmatpush3.msra.mxu0 %v6564_v1  ;;  %5987 = vmatprep.mubr.msk.f32.mxu0 %vm6355_vm0, %v6354_v0 }
  0xa3   : > { %5995 = vmatprep.subr.mxu0 %v6354_v0 }
  0xa5   : > { %5988 = vmatmul.mubr.msk.f32.vlgmr.msra.gmra.mrb[36].mxu0 %vm278_vm1, %v5566_v20 }
  0xa6   : > { %5996 = vmatpush3.msra.mxu0 %v6564_v1  ;;  %5997 = vmatprep.mubr.msk.f32.mxu0 %vm6355_vm0, %v6354_v0 }
  0xa7   : > { %6005 = vmatprep.subr.mxu0 %v6354_v0 }
  0xa9   : > { %5998 = vmatmul.mubr.msk.f32.vlgmr.msra.gmra.mrb[38].mxu0 %vm278_vm1, %v5570_v21 }
  0xaa   : > { %6006 = vmatpush3.msra.mxu0 %v6564_v1  ;;  %6007 = vmatprep.mubr.msk.f32.mxu0 %vm6355_vm0, %v6354_v0 }
  0xab   : > { %6015 = vmatprep.subr.mxu0 %v6354_v0 }
  0xad   : > { %6008 = vmatmul.mubr.msk.f32.vlgmr.msra.gmra.mrb[40].mxu0 %vm278_vm1, %v5578_v22 }
  0xae   : > { %6016 = vmatpush3.msra.mxu0 %v6564_v1  ;;  %6017 = vmatprep.mubr.msk.f32.mxu0 %vm6355_vm0, %v6354_v0 }
  0xaf   : > { %6025 = vmatprep.subr.mxu0 %v6354_v0 }
  0xb1   : > { %6018 = vmatmul.mubr.msk.f32.vlgmr.msra.gmra.mrb[42].mxu0 %vm278_vm1, %v5582_v23 }
  0xb2   : > { %6026 = vmatpush3.msra.mxu0 %v6564_v1  ;;  %6027 = vmatprep.mubr.msk.f32.mxu0 %vm6355_vm0, %v6354_v0 }
  0xb3   : > { %6035 = vmatprep.subr.mxu0 %v6354_v0 }
  0xb5   : > { %6028 = vmatmul.mubr.msk.f32.vlgmr.msra.gmra.mrb[44].mxu0 %vm278_vm1, %v5586_v25 }
  0xb6   : > { %6036 = vmatpush3.msra.mxu0 %v6564_v1  ;;  %6037 = vmatprep.mubr.msk.f32.mxu0 %vm6355_vm0, %v6354_v0 }
  0xb7   : > { %6045 = vmatprep.subr.mxu0 %v6354_v0 }
  0xb9   : > { %6038 = vmatmul.mubr.msk.f32.vlgmr.msra.gmra.mrb[46].mxu0 %vm278_vm1, %v5590_v26 }
  0xba   : > { %6046 = vmatpush3.msra.mxu0 %v6564_v1  ;;  %6047 = vmatprep.mubr.msk.f32.mxu0 %vm6355_vm0, %v6354_v0 }
  0xbb   : > { %6055 = vmatprep.subr.mxu0 %v6354_v0 }
  0xbd   : > { %6048 = vmatmul.mubr.msk.f32.vlgmr.msra.gmra.mrb[48].mxu0 %vm278_vm1, %v5598_v27 }
  0xbe   : > { %6056 = vmatpush3.msra.mxu0 %v6564_v1  ;;  %6057 = vmatprep.mubr.msk.f32.mxu0 %vm6355_vm0, %v6354_v0 }
  0xbf   : > { %6065 = vmatprep.subr.mxu0 %v6354_v0 }
  0xc1   : > { %6058 = vmatmul.mubr.msk.f32.vlgmr.msra.gmra.mrb[50].mxu0 %vm278_vm1, %v5602_v28 }
  0xc2   : > { %6066 = vmatpush3.msra.mxu0 %v6564_v1  ;;  %6067 = vmatprep.mubr.msk.f32.mxu0 %vm6355_vm0, %v6354_v0 }
  0xc3   : > { %6075 = vmatprep.subr.mxu0 %v6354_v0 }
  0xc5   : > { %6068 = vmatmul.mubr.msk.f32.vlgmr.msra.gmra.mrb[52].mxu0 %vm278_vm1, %v5606_v29 }
  0xc6   : > { %6076 = vmatpush3.msra.mxu0 %v6564_v1  ;;  %6077 = vmatprep.mubr.msk.f32.mxu0 %vm6355_vm0, %v6354_v0 }
  0xc7   : > { %6085 = vmatprep.subr.mxu0 %v6354_v0 }
  0xc9   : > { %6078 = vmatmul.mubr.msk.f32.vlgmr.msra.gmra.mrb[54].mxu0 %vm278_vm1, %v5610_v30 }
  0xca   : > { %6086 = vmatpush3.msra.mxu0 %v6564_v1  ;;  %6087 = vmatprep.mubr.msk.f32.mxu0 %vm6355_vm0, %v6354_v0 }
  0xcb   : > { %6095 = vmatprep.subr.mxu0 %v6354_v0 }
  0xcd   : > { %6088 = vmatmul.mubr.msk.f32.vlgmr.msra.gmra.mrb[56].mxu0 %vm278_vm1, %v5618_v31 }
  0xce   : > { %6096 = vmatpush3.msra.mxu0 %v6564_v1  ;;  %6097 = vmatprep.mubr.msk.f32.mxu0 %vm6355_vm0, %v6354_v0 }
  0xcf   : > { %6105 = vmatprep.subr.mxu0 %v6354_v0 }
  0xd1   : > { %6098 = vmatmul.mubr.msk.f32.vlgmr.msra.gmra.mrb[58].mxu0 %vm278_vm1, %v5622_v32 }
  0xd2   : > { %6106 = vmatpush3.msra.mxu0 %v6564_v1  ;;  %6107 = vmatprep.mubr.msk.f32.mxu0 %vm6355_vm0, %v6354_v0 }
  0xd3   : > { %6115 = vmatprep.subr.mxu0 %v6354_v0 }
  0xd5   : > { %6108 = vmatmul.mubr.msk.f32.vlgmr.msra.gmra.mrb[60].mxu0 %vm278_vm1, %v5626_v33 }
  0xd6   : > { %6116 = vmatpush3.msra.mxu0 %v6564_v1  ;;  %6117 = vmatprep.mubr.msk.f32.mxu0 %vm6355_vm0, %v6354_v0 }
  0xd9   : > { %6118 = vmatmul.mubr.msk.f32.vlgmr.msra.gmra.mrb[62].mxu0 %vm278_vm1, %v5630_v34 }
 0x130   : > { %v348_v35 = vpop.f32.mrb[0].mxu0 }
 0x131   : > { %v5809_v37 = vpop.f32.mrb[1].mxu0  ;;  %5810 = vmatprep.subr.mxu1 %v348_v35 }
 0x132   : > { %5811 = vmatpush3.msra.mxu1 %v348_v35 }
 0x133   : > { %5813 = vmatmul.mubr.msk.f32.vlgmr.msra.gmra.mrb[0].mxu1 %vm278_vm1, %v6765_v36 }
 0x134   : > { %v504_v38 = vpop.f32.mrb[2].mxu0  ;;  %5822 = vmatprep.mubr.msk.f32.mxu1 %vm278_vm1, %v6699_v24 }
 0x135   : > { %v5819_v39 = vpop.f32.mrb[3].mxu0  ;;  %5820 = vmatprep.subr.mxu1 %v504_v38 }
 0x136   : > { %5821 = vmatpush3.msra.mxu1 %v504_v38  ;;  %v6893_v39 = vld [vmem:[#allocation5 + $0x8] sm:$0xff] }
 0x137   : > { %5823 = vmatmul.mubr.msk.f32.vlgmr.msra.gmra.mrb[2].mxu1 %vm278_vm1, %v6765_v36 }
 0x138   : > { %v654_v40 = vpop.f32.mrb[4].mxu0  ;;  %5832 = vmatprep.mubr.msk.f32.mxu1 %vm278_vm1, %v6699_v24 }
 0x139   : > { %v5829_v41 = vpop.f32.mrb[5].mxu0  ;;  %5830 = vmatprep.subr.mxu1 %v654_v40 }
 0x13a   : > { %5831 = vmatpush3.msra.mxu1 %v654_v40  ;;  %v6895_v40 = vld [vmem:[#allocation5 + $0x18] sm:$0xff] }
 0x13b   : > { %5833 = vmatmul.mubr.msk.f32.vlgmr.msra.gmra.mrb[4].mxu1 %vm278_vm1, %v6765_v36 }
 0x13c   : > { %v804_v42 = vpop.f32.mrb[6].mxu0  ;;  %5842 = vmatprep.mubr.msk.f32.mxu1 %vm278_vm1, %v6699_v24 }
 0x13d   : > { %v5839_v43 = vpop.f32.mrb[7].mxu0  ;;  %5840 = vmatprep.subr.mxu1 %v804_v42 }
 0x13e   : > { %5841 = vmatpush3.msra.mxu1 %v804_v42  ;;  %v6897_v42 = vld [vmem:[#allocation5] sm:$0xff]  ;;  %v6899_v43 = vld [vmem:[#allocation5 + $0x28] sm:$0xff] }
 0x13f   : > { %5843 = vmatmul.mubr.msk.f32.vlgmr.msra.gmra.mrb[6].mxu1 %vm278_vm1, %v6765_v36 }
 0x140   : > { %v988_v44 = vpop.f32.mrb[8].mxu0  ;;  %5852 = vmatprep.mubr.msk.f32.mxu1 %vm278_vm1, %v6699_v24 }
 0x141   : > { %v5849_v45 = vpop.f32.mrb[9].mxu0  ;;  %5850 = vmatprep.subr.mxu1 %v988_v44 }
 0x142   : > { %5851 = vmatpush3.msra.mxu1 %v988_v44  ;;  %v6901_v44 = vld [vmem:[#allocation5 + $0x38] sm:$0xff]  ;;  %v6903_v45 = vld [vmem:[#allocation5 + $0x10] sm:$0xff] }
 0x143   : > { %5853 = vmatmul.mubr.msk.f32.vlgmr.msra.gmra.mrb[8].mxu1 %vm278_vm1, %v6765_v36 }
 0x144   : > { %v1138_v46 = vpop.f32.mrb[10].mxu0  ;;  %5862 = vmatprep.mubr.msk.f32.mxu1 %vm278_vm1, %v6699_v24 }
 0x145   : > { %v5859_v47 = vpop.f32.mrb[11].mxu0  ;;  %5860 = vmatprep.subr.mxu1 %v1138_v46 }
 0x146   : > { %5861 = vmatpush3.msra.mxu1 %v1138_v46  ;;  %v6907_v46 = vld [vmem:[#allocation5 + $0x30] sm:$0xff] }
 0x147   : > { %5863 = vmatmul.mubr.msk.f32.vlgmr.msra.gmra.mrb[10].mxu1 %vm278_vm1, %v6765_v36 }
 0x148   : > { %v1288_v48 = vpop.f32.mrb[12].mxu0  ;;  %5872 = vmatprep.mubr.msk.f32.mxu1 %vm278_vm1, %v6699_v24 }
 0x149   : > { %v5869_v49 = vpop.f32.mrb[13].mxu0  ;;  %5870 = vmatprep.subr.mxu1 %v1288_v48 }
 0x14a   : > { %5871 = vmatpush3.msra.mxu1 %v1288_v48 }
 0x14b   : > { %5873 = vmatmul.mubr.msk.f32.vlgmr.msra.gmra.mrb[12].mxu1 %vm278_vm1, %v6765_v36 }
 0x14c   : > { %v1438_v50 = vpop.f32.mrb[14].mxu0  ;;  %5882 = vmatprep.mubr.msk.f32.mxu1 %vm278_vm1, %v6699_v24 }
 0x14d   : > { %v5879_v51 = vpop.f32.mrb[15].mxu0  ;;  %5880 = vmatprep.subr.mxu1 %v1438_v50 }
 0x14e   : > { %5881 = vmatpush3.msra.mxu1 %v1438_v50 }
 0x14f   : > { %5883 = vmatmul.mubr.msk.f32.vlgmr.msra.gmra.mrb[14].mxu1 %vm278_vm1, %v6765_v36 }
 0x150   : > { %v1622_v52 = vpop.f32.mrb[16].mxu0  ;;  %5892 = vmatprep.mubr.msk.f32.mxu1 %vm278_vm1, %v6699_v24 }
 0x151   : > { %v5889_v53 = vpop.f32.mrb[17].mxu0  ;;  %5890 = vmatprep.subr.mxu1 %v1622_v52 }
 0x152   : > { %5891 = vmatpush3.msra.mxu1 %v1622_v52 }
 0x153   : > { %5893 = vmatmul.mubr.msk.f32.vlgmr.msra.gmra.mrb[16].mxu1 %vm278_vm1, %v6765_v36 }
 0x154   : > { %v1772_v54 = vpop.f32.mrb[18].mxu0  ;;  %5902 = vmatprep.mubr.msk.f32.mxu1 %vm278_vm1, %v6699_v24 }
 0x155   : > { %v5899_v55 = vpop.f32.mrb[19].mxu0  ;;  %5900 = vmatprep.subr.mxu1 %v1772_v54 }
 0x156   : > { %5901 = vmatpush3.msra.mxu1 %v1772_v54 }
 0x157   : > { %5903 = vmatmul.mubr.msk.f32.vlgmr.msra.gmra.mrb[18].mxu1 %vm278_vm1, %v6765_v36 }
 0x158   : > { %v1922_v56 = vpop.f32.mrb[20].mxu0  ;;  %5912 = vmatprep.mubr.msk.f32.mxu1 %vm278_vm1, %v6699_v24 }
 0x159   : > { %v5909_v57 = vpop.f32.mrb[21].mxu0  ;;  %5910 = vmatprep.subr.mxu1 %v1922_v56 }
 0x15a   : > { %5911 = vmatpush3.msra.mxu1 %v1922_v56  ;;  %v6917_v56 = vld [vmem:[#allocation5 + $0x48] sm:$0xff]  ;;  %v6919_v57 = vld [vmem:[#allocation5 + $0x58] sm:$0xff] }
 0x15b   : > { %5913 = vmatmul.mubr.msk.f32.vlgmr.msra.gmra.mrb[20].mxu1 %vm278_vm1, %v6765_v36 }
 0x15c   : > { %v2072_v58 = vpop.f32.mrb[22].mxu0  ;;  %5922 = vmatprep.mubr.msk.f32.mxu1 %vm278_vm1, %v6699_v24 }
 0x15d   : > { %v5919_v59 = vpop.f32.mrb[23].mxu0  ;;  %5920 = vmatprep.subr.mxu1 %v2072_v58 }
 0x15e   : > { %5921 = vmatpush3.msra.mxu1 %v2072_v58 }
 0x15f   : > { %5923 = vmatmul.mubr.msk.f32.vlgmr.msra.gmra.mrb[22].mxu1 %vm278_vm1, %v6765_v36 }
 0x160   : > { %v2256_v60 = vpop.f32.mrb[24].mxu0  ;;  %5932 = vmatprep.mubr.msk.f32.mxu1 %vm278_vm1, %v6699_v24 }
 0x161   : > { %v5929_v61 = vpop.f32.mrb[25].mxu0  ;;  %5930 = vmatprep.subr.mxu1 %v2256_v60 }
 0x162   : > { %5931 = vmatpush3.msra.mxu1 %v2256_v60  ;;  %v6921_v60 = vld [vmem:[#allocation5 + $0x40] sm:$0xff]  ;;  %v6923_v61 = vld [vmem:[#allocation5 + $0x50] sm:$0xff] }
 0x163   : > { %5933 = vmatmul.mubr.msk.f32.vlgmr.msra.gmra.mrb[24].mxu1 %vm278_vm1, %v6765_v36 }
 0x164   : > { %v2406_v62 = vpop.f32.mrb[26].mxu0  ;;  %5942 = vmatprep.mubr.msk.f32.mxu1 %vm278_vm1, %v6699_v24 }
 0x165   : > { %v5939_v63 = vpop.f32.mrb[27].mxu0  ;;  %5940 = vmatprep.subr.mxu1 %v2406_v62 }
 0x166   : > { %5941 = vmatpush3.msra.mxu1 %v2406_v62 }
 0x167   : > { %5943 = vmatmul.mubr.msk.f32.vlgmr.msra.gmra.mrb[26].mxu1 %vm278_vm1, %v6765_v36 }
 0x168   : > { %v2556_v0 = vpop.f32.mrb[28].mxu0  ;;  %5952 = vmatprep.mubr.msk.f32.mxu1 %vm278_vm1, %v6699_v24 }
 0x169   : > { %v5949_v1 = vpop.f32.mrb[29].mxu0  ;;  %5950 = vmatprep.subr.mxu1 %v2556_v0 }
 0x16a   : > { %5951 = vmatpush3.msra.mxu1 %v2556_v0 }
 0x16b   : > { %5953 = vmatmul.mubr.msk.f32.vlgmr.msra.gmra.mrb[28].mxu1 %vm278_vm1, %v6765_v36 }
 0x16c   : > { %v2706_v2 = vpop.f32.mrb[30].mxu0  ;;  %5962 = vmatprep.mubr.msk.f32.mxu1 %vm278_vm1, %v6699_v24 }
 0x16d   : > { %v5959_v3 = vpop.f32.mrb[31].mxu0  ;;  %5960 = vmatprep.subr.mxu1 %v2706_v2 }
 0x16e   : > { %5961 = vmatpush3.msra.mxu1 %v2706_v2 }
 0x16f   : > { %5963 = vmatmul.mubr.msk.f32.vlgmr.msra.gmra.mrb[30].mxu1 %vm278_vm1, %v6765_v36 }
 0x170   : > { %v2890_v4 = vpop.f32.mrb[32].mxu0  ;;  %5972 = vmatprep.mubr.msk.f32.mxu1 %vm278_vm1, %v6699_v24 }
 0x171   : > { %v5969_v5 = vpop.f32.mrb[33].mxu0  ;;  %5970 = vmatprep.subr.mxu1 %v2890_v4 }
 0x172   : > { %5971 = vmatpush3.msra.mxu1 %v2890_v4 }
 0x173   : > { %5973 = vmatmul.mubr.msk.f32.vlgmr.msra.gmra.mrb[32].mxu1 %vm278_vm1, %v6765_v36 }
 0x174   : > { %v3040_v6 = vpop.f32.mrb[34].mxu0  ;;  %5982 = vmatprep.mubr.msk.f32.mxu1 %vm278_vm1, %v6699_v24 }
 0x175   : > { %v5979_v7 = vpop.f32.mrb[35].mxu0  ;;  %5980 = vmatprep.subr.mxu1 %v3040_v6 }
 0x176   : > { %5981 = vmatpush3.msra.mxu1 %v3040_v6  ;;  %v6929_v6 = vld [vmem:[#allocation5 + $0x68] sm:$0xff]  ;;  %v6931_v7 = vld [vmem:[#allocation5 + $0x78] sm:$0xff] }
 0x177   : > { %5983 = vmatmul.mubr.msk.f32.vlgmr.msra.gmra.mrb[34].mxu1 %vm278_vm1, %v6765_v36 }
 0x178   : > { %v3190_v8 = vpop.f32.mrb[36].mxu0  ;;  %5992 = vmatprep.mubr.msk.f32.mxu1 %vm278_vm1, %v6699_v24 }
 0x179   : > { %v5989_v9 = vpop.f32.mrb[37].mxu0  ;;  %5990 = vmatprep.subr.mxu1 %v3190_v8 }
 0x17a   : > { %5991 = vmatpush3.msra.mxu1 %v3190_v8 }
 0x17b   : > { %5993 = vmatmul.mubr.msk.f32.vlgmr.msra.gmra.mrb[36].mxu1 %vm278_vm1, %v6765_v36 }
 0x17c   : > { %v3340_v10 = vpop.f32.mrb[38].mxu0  ;;  %6002 = vmatprep.mubr.msk.f32.mxu1 %vm278_vm1, %v6699_v24 }
 0x17d   : > { %v5999_v11 = vpop.f32.mrb[39].mxu0  ;;  %6000 = vmatprep.subr.mxu1 %v3340_v10 }
 0x17e   : > { %6001 = vmatpush3.msra.mxu1 %v3340_v10  ;;  %v6933_v10 = vld [vmem:[#allocation5 + $0x60] sm:$0xff]  ;;  %v6935_v11 = vld [vmem:[#allocation5 + $0x70] sm:$0xff] }
 0x17f   : > { %6003 = vmatmul.mubr.msk.f32.vlgmr.msra.gmra.mrb[38].mxu1 %vm278_vm1, %v6765_v36 }
 0x180   : > { %v3524_v12 = vpop.f32.mrb[40].mxu0  ;;  %6012 = vmatprep.mubr.msk.f32.mxu1 %vm278_vm1, %v6699_v24 }
 0x181   : > { %v6009_v13 = vpop.f32.mrb[41].mxu0  ;;  %6010 = vmatprep.subr.mxu1 %v3524_v12 }
 0x182   : > { %6011 = vmatpush3.msra.mxu1 %v3524_v12 }
 0x183   : > { %6013 = vmatmul.mubr.msk.f32.vlgmr.msra.gmra.mrb[40].mxu1 %vm278_vm1, %v6765_v36 }
 0x184   : > { %v3674_v14 = vpop.f32.mrb[42].mxu0  ;;  %6022 = vmatprep.mubr.msk.f32.mxu1 %vm278_vm1, %v6699_v24 }
 0x185   : > { %v6019_v15 = vpop.f32.mrb[43].mxu0  ;;  %6020 = vmatprep.subr.mxu1 %v3674_v14 }
 0x186   : > { %6021 = vmatpush3.msra.mxu1 %v3674_v14 }
 0x187   : > { %6023 = vmatmul.mubr.msk.f32.vlgmr.msra.gmra.mrb[42].mxu1 %vm278_vm1, %v6765_v36 }
 0x188   : > { %v3824_v16 = vpop.f32.mrb[44].mxu0  ;;  %6032 = vmatprep.mubr.msk.f32.mxu1 %vm278_vm1, %v6699_v24 }
 0x189   : > { %v6029_v17 = vpop.f32.mrb[45].mxu0  ;;  %6030 = vmatprep.subr.mxu1 %v3824_v16 }
 0x18a   : > { %6031 = vmatpush3.msra.mxu1 %v3824_v16 }
 0x18b   : > { %6033 = vmatmul.mubr.msk.f32.vlgmr.msra.gmra.mrb[44].mxu1 %vm278_vm1, %v6765_v36 }
 0x18c   : > { %v3974_v18 = vpop.f32.mrb[46].mxu0  ;;  %6042 = vmatprep.mubr.msk.f32.mxu1 %vm278_vm1, %v6699_v24 }
 0x18d   : > { %v6039_v19 = vpop.f32.mrb[47].mxu0  ;;  %6040 = vmatprep.subr.mxu1 %v3974_v18 }
 0x18e   : > { %6041 = vmatpush3.msra.mxu1 %v3974_v18 }
 0x18f   : > { %6043 = vmatmul.mubr.msk.f32.vlgmr.msra.gmra.mrb[46].mxu1 %vm278_vm1, %v6765_v36 }
 0x190   : > { %v4158_v20 = vpop.f32.mrb[48].mxu0  ;;  %6052 = vmatprep.mubr.msk.f32.mxu1 %vm278_vm1, %v6699_v24 }
 0x191   : > { %v6049_v21 = vpop.f32.mrb[49].mxu0  ;;  %6050 = vmatprep.subr.mxu1 %v4158_v20 }
 0x192   : > { %6051 = vmatpush3.msra.mxu1 %v4158_v20 }
 0x193   : > { %6053 = vmatmul.mubr.msk.f32.vlgmr.msra.gmra.mrb[48].mxu1 %vm278_vm1, %v6765_v36 }
 0x194   : > { %v4308_v22 = vpop.f32.mrb[50].mxu0  ;;  %6062 = vmatprep.mubr.msk.f32.mxu1 %vm278_vm1, %v6699_v24 }
 0x195   : > { %v6059_v23 = vpop.f32.mrb[51].mxu0  ;;  %6060 = vmatprep.subr.mxu1 %v4308_v22 }
 0x196   : > { %6061 = vmatpush3.msra.mxu1 %v4308_v22 }
 0x197   : > { %6063 = vmatmul.mubr.msk.f32.vlgmr.msra.gmra.mrb[50].mxu1 %vm278_vm1, %v6765_v36 }
 0x198   : > { %v4458_v25 = vpop.f32.mrb[52].mxu0  ;;  %6072 = vmatprep.mubr.msk.f32.mxu1 %vm278_vm1, %v6699_v24 }
 0x199   : > { %v6069_v26 = vpop.f32.mrb[53].mxu0  ;;  %6070 = vmatprep.subr.mxu1 %v4458_v25 }
 0x19a   : > { %6071 = vmatpush3.msra.mxu1 %v4458_v25 }
 0x19b   : > { %6073 = vmatmul.mubr.msk.f32.vlgmr.msra.gmra.mrb[52].mxu1 %vm278_vm1, %v6765_v36 }
 0x19c   : > { %v4608_v27 = vpop.f32.mrb[54].mxu0  ;;  %6082 = vmatprep.mubr.msk.f32.mxu1 %vm278_vm1, %v6699_v24 }
 0x19d   : > { %v6079_v28 = vpop.f32.mrb[55].mxu0  ;;  %6080 = vmatprep.subr.mxu1 %v4608_v27 }
 0x19e   : > { %6081 = vmatpush3.msra.mxu1 %v4608_v27 }
 0x19f   : > { %6083 = vmatmul.mubr.msk.f32.vlgmr.msra.gmra.mrb[54].mxu1 %vm278_vm1, %v6765_v36 }
 0x1a0   : > { %v4792_v29 = vpop.f32.mrb[56].mxu0  ;;  %6092 = vmatprep.mubr.msk.f32.mxu1 %vm278_vm1, %v6699_v24 }
 0x1a1   : > { %v6089_v30 = vpop.f32.mrb[57].mxu0  ;;  %6090 = vmatprep.subr.mxu1 %v4792_v29 }
 0x1a2   : > { %6091 = vmatpush3.msra.mxu1 %v4792_v29 }
 0x1a3   : > { %6093 = vmatmul.mubr.msk.f32.vlgmr.msra.gmra.mrb[56].mxu1 %vm278_vm1, %v6765_v36 }
 0x1a4   : > { %v4942_v31 = vpop.f32.mrb[58].mxu0  ;;  %6102 = vmatprep.mubr.msk.f32.mxu1 %vm278_vm1, %v6699_v24 }
 0x1a5   : > { %v6099_v32 = vpop.f32.mrb[59].mxu0  ;;  %6100 = vmatprep.subr.mxu1 %v4942_v31 }
 0x1a6   : > { %6101 = vmatpush3.msra.mxu1 %v4942_v31 }
 0x1a7   : > { %6103 = vmatmul.mubr.msk.f32.vlgmr.msra.gmra.mrb[58].mxu1 %vm278_vm1, %v6765_v36 }
 0x1a8   : > { %v5092_v33 = vpop.f32.mrb[60].mxu0  ;;  %6112 = vmatprep.mubr.msk.f32.mxu1 %vm278_vm1, %v6699_v24 }
 0x1a9   : > { %v6109_v34 = vpop.f32.mrb[61].mxu0  ;;  %6110 = vmatprep.subr.mxu1 %v5092_v33 }
 0x1aa   : > { %6111 = vmatpush3.msra.mxu1 %v5092_v33 }
 0x1ab   : > { %6113 = vmatmul.mubr.msk.f32.vlgmr.msra.gmra.mrb[60].mxu1 %vm278_vm1, %v6765_v36 }
 0x1ac   : > { %v5242_v35 = vpop.f32.mrb[62].mxu0  ;;  %6122 = vmatprep.mubr.msk.f32.mxu1 %vm278_vm1, %v6699_v24  ;;  %v6905_v24 = vld [vmem:[#allocation5 + $0x20] sm:$0xff] }
 0x1ad   : > { %v6119_v37 = vpop.f32.mrb[63].mxu0  ;;  %6120 = vmatprep.subr.mxu1 %v5242_v35 }
 0x1ae   : > { %6121 = vmatpush3.msra.mxu1 %v5242_v35 }
 0x1af   : > { %6123 = vmatmul.mubr.msk.f32.vlgmr.msra.gmra.mrb[62].mxu1 %vm278_vm1, %v6765_v36 }
 0x206   : > { %v5814_v38 = vpop.f32.mrb[0].mxu1 }
 0x207   : > { %v424_v41 = vpop.f32.mrb[1].mxu1  ;;  %v884_v36 = vmul.f32 %v5814_v38, %v6893_v39  ;;  %v901_v48 = vmul.f32 %v5814_v38, %v6895_v40 }
 0x208   : > { %v883_v52 = vmul.f32 %v424_v41, %v6897_v42  ;;  %v900_v53 = vmul.f32 %v424_v41, %v6903_v45 }
 0x20a   : > { %v5824_v47 = vpop.f32.mrb[2].mxu1 }
 0x20b   : > { %v886_v49 = vmul.f32 %v5824_v47, %v6899_v43  ;;  %v903_v50 = vmul.f32 %v5824_v47, %v6901_v44  ;;  %v574_v51 = vpop.f32.mrb[3].mxu1 }
 0x20c   : > { %v885_v54 = vmul.f32 %v574_v51, %v6905_v24  ;;  %v902_v55 = vmul.f32 %v574_v51, %v6907_v46 }
 0x20d   : > { %v888_v58 = vadd.f32 %v886_v49, %v884_v36  ;;  %v905_v59 = vadd.f32 %v903_v50, %v901_v48 }
 0x20e   : > { %v887_v62 = vadd.f32 %v885_v54, %v883_v52  ;;  %v904_v63 = vadd.f32 %v902_v55, %v900_v53  ;;  %v5834_v0 = vpop.f32.mrb[4].mxu1 }
 0x20f   : > { %v890_v1 = vmul.f32 %v5834_v0, %v6917_v56  ;;  %v907_v2 = vmul.f32 %v5834_v0, %v6919_v57  ;;  %v724_v3 = vpop.f32.mrb[5].mxu1 }
 0x210   : > { %v889_v4 = vmul.f32 %v724_v3, %v6921_v60  ;;  %v906_v5 = vmul.f32 %v724_v3, %v6923_v61 }
 0x211   : > { %v892_v8 = vadd.f32 %v890_v1, %v888_v58  ;;  %v909_v9 = vadd.f32 %v907_v2, %v905_v59 }
 0x212   : > { %v891_v12 = vadd.f32 %v889_v4, %v887_v62  ;;  %v908_v13 = vadd.f32 %v906_v5, %v904_v63  ;;  %v5844_v14 = vpop.f32.mrb[6].mxu1 }
 0x213   : > { %v894_v15 = vmul.f32 %v5844_v14, %v6929_v6  ;;  %v911_v16 = vmul.f32 %v5844_v14, %v6931_v7  ;;  %v874_v17 = vpop.f32.mrb[7].mxu1 }
 0x214   : > { %v893_v18 = vmul.f32 %v874_v17, %v6933_v10  ;;  %v910_v19 = vmul.f32 %v874_v17, %v6935_v11 }
 0x215   : > { %v896_v20 = vadd.f32 %v894_v15, %v892_v8  ;;  %v913_v21 = vadd.f32 %v911_v16, %v909_v9 }
 0x216   : > { %v895_v22 = vadd.f32 %v893_v18, %v891_v12  ;;  %v912_v23 = vadd.f32 %v910_v19, %v908_v13  ;;  %v5854_v25 = vpop.f32.mrb[8].mxu1 }
 0x217   : > { %899 = vst.msk [vmem:[%s6943_s28 + $0x8] sm:$0xff] %vm897_vm2, %v896_v20  ;;  %5497 = vst.msk [vmem:[%s6943_s28 + $0x18] sm:$0xff] %vm897_vm2, %v913_v21  ;;  %v1058_v26 = vpop.f32.mrb[9].mxu1  ;;  %v1518_v28 = vmul.f32 %v5854_v25, %v6893_v39  ;;  %v1535_v29 = vmul.f32 %v5854_v25, %v6895_v40 }
 0x218   : > { %898 = vst.msk [vmem:[%s6943_s28] sm:$0xff] %vm897_vm2, %v895_v22  ;;  %5496 = vst.msk [vmem:[%s6943_s28 + $0x10] sm:$0xff] %vm897_vm2, %v912_v23  ;;  %v1517_v33 = vmul.f32 %v1058_v26, %v6897_v42  ;;  %v1534_v34 = vmul.f32 %v1058_v26, %v6903_v45 }
 0x21a   : > { %v5864_v27 = vpop.f32.mrb[10].mxu1 }
 0x21b   : > { %v1520_v30 = vmul.f32 %v5864_v27, %v6899_v43  ;;  %v1537_v31 = vmul.f32 %v5864_v27, %v6901_v44  ;;  %v1208_v32 = vpop.f32.mrb[11].mxu1 }
 0x21c   : > { %v1519_v35 = vmul.f32 %v1208_v32, %v6905_v24  ;;  %v1536_v37 = vmul.f32 %v1208_v32, %v6907_v46 }
 0x21d   : > { %v1522_v38 = vadd.f32 %v1520_v30, %v1518_v28  ;;  %v1539_v41 = vadd.f32 %v1537_v31, %v1535_v29 }
 0x21e   : > { %v1521_v47 = vadd.f32 %v1519_v35, %v1517_v33  ;;  %v1538_v36 = vadd.f32 %v1536_v37, %v1534_v34  ;;  %v5874_v48 = vpop.f32.mrb[12].mxu1 }
 0x21f   : > { %v1524_v49 = vmul.f32 %v5874_v48, %v6917_v56  ;;  %v1541_v50 = vmul.f32 %v5874_v48, %v6919_v57  ;;  %v1358_v51 = vpop.f32.mrb[13].mxu1 }
 0x220   : > { %v1523_v52 = vmul.f32 %v1358_v51, %v6921_v60  ;;  %v1540_v53 = vmul.f32 %v1358_v51, %v6923_v61 }
 0x221   : > { %v1526_v54 = vadd.f32 %v1524_v49, %v1522_v38  ;;  %v1543_v55 = vadd.f32 %v1541_v50, %v1539_v41 }
 0x222   : > { %v1525_v58 = vadd.f32 %v1523_v52, %v1521_v47  ;;  %v1542_v59 = vadd.f32 %v1540_v53, %v1538_v36  ;;  %v5884_v62 = vpop.f32.mrb[14].mxu1 }
 0x223   : > { %v1528_v63 = vmul.f32 %v5884_v62, %v6929_v6  ;;  %v1545_v0 = vmul.f32 %v5884_v62, %v6931_v7  ;;  %v1508_v1 = vpop.f32.mrb[15].mxu1 }
 0x224   : > { %v1527_v2 = vmul.f32 %v1508_v1, %v6933_v10  ;;  %v1544_v3 = vmul.f32 %v1508_v1, %v6935_v11 }
 0x225   : > { %v1530_v4 = vadd.f32 %v1528_v63, %v1526_v54  ;;  %v1547_v5 = vadd.f32 %v1545_v0, %v1543_v55 }
 0x226   : > { %v1529_v8 = vadd.f32 %v1527_v2, %v1525_v58  ;;  %v1546_v9 = vadd.f32 %v1544_v3, %v1542_v59  ;;  %v5894_v12 = vpop.f32.mrb[16].mxu1 }
 0x227   : > { %5515 = vst.msk [vmem:[%s6943_s28 + $0x28] sm:$0xff] %vm897_vm2, %v1530_v4  ;;  %5517 = vst.msk [vmem:[%s6943_s28 + $0x38] sm:$0xff] %vm897_vm2, %v1547_v5  ;;  %v1692_v13 = vpop.f32.mrb[17].mxu1  ;;  %v2152_v15 = vmul.f32 %v5894_v12, %v6893_v39  ;;  %v2169_v16 = vmul.f32 %v5894_v12, %v6895_v40 }
 0x228   : > { %5514 = vst.msk [vmem:[%s6943_s28 + $0x20] sm:$0xff] %vm897_vm2, %v1529_v8  ;;  %5516 = vst.msk [vmem:[%s6943_s28 + $0x30] sm:$0xff] %vm897_vm2, %v1546_v9  ;;  %v2151_v20 = vmul.f32 %v1692_v13, %v6897_v42  ;;  %v2168_v21 = vmul.f32 %v1692_v13, %v6903_v45 }
 0x22a   : > { %v5904_v14 = vpop.f32.mrb[18].mxu1 }
 0x22b   : > { %v2154_v17 = vmul.f32 %v5904_v14, %v6899_v43  ;;  %v2171_v18 = vmul.f32 %v5904_v14, %v6901_v44  ;;  %v1842_v19 = vpop.f32.mrb[19].mxu1 }
 0x22c   : > { %v2153_v22 = vmul.f32 %v1842_v19, %v6905_v24  ;;  %v2170_v23 = vmul.f32 %v1842_v19, %v6907_v46 }
 0x22d   : > { %v2156_v25 = vadd.f32 %v2154_v17, %v2152_v15  ;;  %v2173_v26 = vadd.f32 %v2171_v18, %v2169_v16 }
 0x22e   : > { %v2155_v27 = vadd.f32 %v2153_v22, %v2151_v20  ;;  %v2172_v28 = vadd.f32 %v2170_v23, %v2168_v21  ;;  %v5914_v29 = vpop.f32.mrb[20].mxu1 }
 0x22f   : > { %v2158_v30 = vmul.f32 %v5914_v29, %v6917_v56  ;;  %v2175_v31 = vmul.f32 %v5914_v29, %v6919_v57  ;;  %v1992_v32 = vpop.f32.mrb[21].mxu1 }
 0x230   : > { %v2157_v33 = vmul.f32 %v1992_v32, %v6921_v60  ;;  %v2174_v34 = vmul.f32 %v1992_v32, %v6923_v61 }
 0x231   : > { %v2160_v35 = vadd.f32 %v2158_v30, %v2156_v25  ;;  %v2177_v37 = vadd.f32 %v2175_v31, %v2173_v26 }
 0x232   : > { %v2159_v38 = vadd.f32 %v2157_v33, %v2155_v27  ;;  %v2176_v41 = vadd.f32 %v2174_v34, %v2172_v28  ;;  %v5924_v47 = vpop.f32.mrb[22].mxu1 }
 0x233   : > { %v2162_v36 = vmul.f32 %v5924_v47, %v6929_v6  ;;  %v2179_v48 = vmul.f32 %v5924_v47, %v6931_v7  ;;  %v2142_v49 = vpop.f32.mrb[23].mxu1 }
 0x234   : > { %v2161_v50 = vmul.f32 %v2142_v49, %v6933_v10  ;;  %v2178_v51 = vmul.f32 %v2142_v49, %v6935_v11 }
 0x235   : > { %v2164_v52 = vadd.f32 %v2162_v36, %v2160_v35  ;;  %v2181_v53 = vadd.f32 %v2179_v48, %v2177_v37 }
 0x236   : > { %v2163_v54 = vadd.f32 %v2161_v50, %v2159_v38  ;;  %v2180_v55 = vadd.f32 %v2178_v51, %v2176_v41  ;;  %v5934_v58 = vpop.f32.mrb[24].mxu1 }
 0x237   : > { %5535 = vst.msk [vmem:[%s6943_s28 + $0x48] sm:$0xff] %vm897_vm2, %v2164_v52  ;;  %5537 = vst.msk [vmem:[%s6943_s28 + $0x58] sm:$0xff] %vm897_vm2, %v2181_v53  ;;  %v2326_v59 = vpop.f32.mrb[25].mxu1  ;;  %v2786_v63 = vmul.f32 %v5934_v58, %v6893_v39  ;;  %v2803_v0 = vmul.f32 %v5934_v58, %v6895_v40 }
 0x238   : > { %5534 = vst.msk [vmem:[%s6943_s28 + $0x40] sm:$0xff] %vm897_vm2, %v2163_v54  ;;  %5536 = vst.msk [vmem:[%s6943_s28 + $0x50] sm:$0xff] %vm897_vm2, %v2180_v55  ;;  %v2785_v4 = vmul.f32 %v2326_v59, %v6897_v42  ;;  %v2802_v5 = vmul.f32 %v2326_v59, %v6903_v45 }
 0x23a   : > { %v5944_v62 = vpop.f32.mrb[26].mxu1 }
 0x23b   : > { %v2788_v1 = vmul.f32 %v5944_v62, %v6899_v43  ;;  %v2805_v2 = vmul.f32 %v5944_v62, %v6901_v44  ;;  %v2476_v3 = vpop.f32.mrb[27].mxu1 }
 0x23c   : > { %v2787_v8 = vmul.f32 %v2476_v3, %v6905_v24  ;;  %v2804_v9 = vmul.f32 %v2476_v3, %v6907_v46 }
 0x23d   : > { %v2790_v12 = vadd.f32 %v2788_v1, %v2786_v63  ;;  %v2807_v13 = vadd.f32 %v2805_v2, %v2803_v0 }
 0x23e   : > { %v2789_v14 = vadd.f32 %v2787_v8, %v2785_v4  ;;  %v2806_v15 = vadd.f32 %v2804_v9, %v2802_v5  ;;  %v5954_v16 = vpop.f32.mrb[28].mxu1 }
 0x23f   : > { %v2792_v17 = vmul.f32 %v5954_v16, %v6917_v56  ;;  %v2809_v18 = vmul.f32 %v5954_v16, %v6919_v57  ;;  %v2626_v19 = vpop.f32.mrb[29].mxu1 }
 0x240   : > { %v2791_v20 = vmul.f32 %v2626_v19, %v6921_v60  ;;  %v2808_v21 = vmul.f32 %v2626_v19, %v6923_v61 }
 0x241   : > { %v2794_v22 = vadd.f32 %v2792_v17, %v2790_v12  ;;  %v2811_v23 = vadd.f32 %v2809_v18, %v2807_v13 }
 0x242   : > { %v2793_v25 = vadd.f32 %v2791_v20, %v2789_v14  ;;  %v2810_v26 = vadd.f32 %v2808_v21, %v2806_v15  ;;  %v5964_v27 = vpop.f32.mrb[30].mxu1 }
 0x243   : > { %v2796_v28 = vmul.f32 %v5964_v27, %v6929_v6  ;;  %v2813_v29 = vmul.f32 %v5964_v27, %v6931_v7  ;;  %v2776_v30 = vpop.f32.mrb[31].mxu1 }
 0x244   : > { %v2795_v31 = vmul.f32 %v2776_v30, %v6933_v10  ;;  %v2812_v32 = vmul.f32 %v2776_v30, %v6935_v11 }
 0x245   : > { %v2798_v33 = vadd.f32 %v2796_v28, %v2794_v22  ;;  %v2815_v34 = vadd.f32 %v2813_v29, %v2811_v23 }
 0x246   : > { %v2797_v35 = vadd.f32 %v2795_v31, %v2793_v25  ;;  %v2814_v37 = vadd.f32 %v2812_v32, %v2810_v26  ;;  %v5974_v38 = vpop.f32.mrb[32].mxu1 }
 0x247   : > { %5555 = vst.msk [vmem:[%s6943_s28 + $0x68] sm:$0xff] %vm897_vm2, %v2798_v33  ;;  %5557 = vst.msk [vmem:[%s6943_s28 + $0x78] sm:$0xff] %vm897_vm2, %v2815_v34  ;;  %v2960_v41 = vpop.f32.mrb[33].mxu1  ;;  %v3420_v36 = vmul.f32 %v5974_v38, %v6893_v39  ;;  %v3437_v48 = vmul.f32 %v5974_v38, %v6895_v40 }
 0x248   : > { %5554 = vst.msk [vmem:[%s6943_s28 + $0x60] sm:$0xff] %vm897_vm2, %v2797_v35  ;;  %5556 = vst.msk [vmem:[%s6943_s28 + $0x70] sm:$0xff] %vm897_vm2, %v2814_v37  ;;  %v3419_v52 = vmul.f32 %v2960_v41, %v6897_v42  ;;  %v3436_v53 = vmul.f32 %v2960_v41, %v6903_v45 }
 0x24a   : > { %v5984_v47 = vpop.f32.mrb[34].mxu1 }
 0x24b   : > { %v3422_v49 = vmul.f32 %v5984_v47, %v6899_v43  ;;  %v3439_v50 = vmul.f32 %v5984_v47, %v6901_v44  ;;  %v3110_v51 = vpop.f32.mrb[35].mxu1 }
 0x24c   : > { %v3421_v54 = vmul.f32 %v3110_v51, %v6905_v24  ;;  %v3438_v55 = vmul.f32 %v3110_v51, %v6907_v46 }
 0x24d   : > { %v3424_v58 = vadd.f32 %v3422_v49, %v3420_v36  ;;  %v3441_v59 = vadd.f32 %v3439_v50, %v3437_v48 }
 0x24e   : > { %v3423_v62 = vadd.f32 %v3421_v54, %v3419_v52  ;;  %v3440_v63 = vadd.f32 %v3438_v55, %v3436_v53  ;;  %v5994_v0 = vpop.f32.mrb[36].mxu1 }
 0x24f   : > { %v3426_v1 = vmul.f32 %v5994_v0, %v6917_v56  ;;  %v3443_v2 = vmul.f32 %v5994_v0, %v6919_v57  ;;  %v3260_v3 = vpop.f32.mrb[37].mxu1 }
 0x250   : > { %v3425_v4 = vmul.f32 %v3260_v3, %v6921_v60  ;;  %v3442_v5 = vmul.f32 %v3260_v3, %v6923_v61 }
 0x251   : > { %v3428_v8 = vadd.f32 %v3426_v1, %v3424_v58  ;;  %v3445_v9 = vadd.f32 %v3443_v2, %v3441_v59 }
 0x252   : > { %v3427_v12 = vadd.f32 %v3425_v4, %v3423_v62  ;;  %v3444_v13 = vadd.f32 %v3442_v5, %v3440_v63  ;;  %v6004_v14 = vpop.f32.mrb[38].mxu1 }
 0x253   : > { %v3430_v15 = vmul.f32 %v6004_v14, %v6929_v6  ;;  %v3447_v16 = vmul.f32 %v6004_v14, %v6931_v7  ;;  %v3410_v17 = vpop.f32.mrb[39].mxu1 }
 0x254   : > { %v3429_v18 = vmul.f32 %v3410_v17, %v6933_v10  ;;  %v3446_v19 = vmul.f32 %v3410_v17, %v6935_v11 }
 0x255   : > { %v3432_v20 = vadd.f32 %v3430_v15, %v3428_v8  ;;  %v3449_v21 = vadd.f32 %v3447_v16, %v3445_v9 }
 0x256   : > { %v3431_v22 = vadd.f32 %v3429_v18, %v3427_v12  ;;  %v3448_v23 = vadd.f32 %v3446_v19, %v3444_v13  ;;  %v6014_v25 = vpop.f32.mrb[40].mxu1 }
 0x257   : > { %5575 = vst.msk [vmem:[%s6943_s28 + $0x88] sm:$0xff] %vm897_vm2, %v3432_v20  ;;  %5577 = vst.msk [vmem:[%s6943_s28 + $0x98] sm:$0xff] %vm897_vm2, %v3449_v21  ;;  %v3594_v26 = vpop.f32.mrb[41].mxu1  ;;  %v4054_v28 = vmul.f32 %v6014_v25, %v6893_v39  ;;  %v4071_v29 = vmul.f32 %v6014_v25, %v6895_v40 }
 0x258   : > { %5574 = vst.msk [vmem:[%s6943_s28 + $0x80] sm:$0xff] %vm897_vm2, %v3431_v22  ;;  %5576 = vst.msk [vmem:[%s6943_s28 + $0x90] sm:$0xff] %vm897_vm2, %v3448_v23  ;;  %v4053_v33 = vmul.f32 %v3594_v26, %v6897_v42  ;;  %v4070_v34 = vmul.f32 %v3594_v26, %v6903_v45 }
 0x25a   : > { %v6024_v27 = vpop.f32.mrb[42].mxu1 }
 0x25b   : > { %v4056_v30 = vmul.f32 %v6024_v27, %v6899_v43  ;;  %v4073_v31 = vmul.f32 %v6024_v27, %v6901_v44  ;;  %v3744_v32 = vpop.f32.mrb[43].mxu1 }
 0x25c   : > { %v4055_v35 = vmul.f32 %v3744_v32, %v6905_v24  ;;  %v4072_v37 = vmul.f32 %v3744_v32, %v6907_v46 }
 0x25d   : > { %v4058_v38 = vadd.f32 %v4056_v30, %v4054_v28  ;;  %v4075_v41 = vadd.f32 %v4073_v31, %v4071_v29 }
 0x25e   : > { %v4057_v47 = vadd.f32 %v4055_v35, %v4053_v33  ;;  %v4074_v36 = vadd.f32 %v4072_v37, %v4070_v34  ;;  %v6034_v48 = vpop.f32.mrb[44].mxu1 }
 0x25f   : > { %v4060_v49 = vmul.f32 %v6034_v48, %v6917_v56  ;;  %v4077_v50 = vmul.f32 %v6034_v48, %v6919_v57  ;;  %v3894_v51 = vpop.f32.mrb[45].mxu1 }
 0x260   : > { %v4059_v52 = vmul.f32 %v3894_v51, %v6921_v60  ;;  %v4076_v53 = vmul.f32 %v3894_v51, %v6923_v61 }
 0x261   : > { %v4062_v54 = vadd.f32 %v4060_v49, %v4058_v38  ;;  %v4079_v55 = vadd.f32 %v4077_v50, %v4075_v41 }
 0x262   : > { %v4061_v58 = vadd.f32 %v4059_v52, %v4057_v47  ;;  %v4078_v59 = vadd.f32 %v4076_v53, %v4074_v36  ;;  %v6044_v62 = vpop.f32.mrb[46].mxu1 }
 0x263   : > { %v4064_v63 = vmul.f32 %v6044_v62, %v6929_v6  ;;  %v4081_v0 = vmul.f32 %v6044_v62, %v6931_v7  ;;  %v4044_v1 = vpop.f32.mrb[47].mxu1 }
 0x264   : > { %v4063_v2 = vmul.f32 %v4044_v1, %v6933_v10  ;;  %v4080_v3 = vmul.f32 %v4044_v1, %v6935_v11 }
 0x265   : > { %v4066_v4 = vadd.f32 %v4064_v63, %v4062_v54  ;;  %v4083_v5 = vadd.f32 %v4081_v0, %v4079_v55 }
 0x266   : > { %v4065_v8 = vadd.f32 %v4063_v2, %v4061_v58  ;;  %v4082_v9 = vadd.f32 %v4080_v3, %v4078_v59  ;;  %v6054_v12 = vpop.f32.mrb[48].mxu1 }
 0x267   : > { %5595 = vst.msk [vmem:[%s6943_s28 + $0xa8] sm:$0xff] %vm897_vm2, %v4066_v4  ;;  %5597 = vst.msk [vmem:[%s6943_s28 + $0xb8] sm:$0xff] %vm897_vm2, %v4083_v5  ;;  %v4228_v13 = vpop.f32.mrb[49].mxu1  ;;  %v4688_v15 = vmul.f32 %v6054_v12, %v6893_v39  ;;  %v4705_v16 = vmul.f32 %v6054_v12, %v6895_v40 }
 0x268   : > { %5594 = vst.msk [vmem:[%s6943_s28 + $0xa0] sm:$0xff] %vm897_vm2, %v4065_v8  ;;  %5596 = vst.msk [vmem:[%s6943_s28 + $0xb0] sm:$0xff] %vm897_vm2, %v4082_v9  ;;  %v4687_v20 = vmul.f32 %v4228_v13, %v6897_v42  ;;  %v4704_v21 = vmul.f32 %v4228_v13, %v6903_v45 }
 0x26a   : > { %v6064_v14 = vpop.f32.mrb[50].mxu1 }
 0x26b   : > { %v4690_v17 = vmul.f32 %v6064_v14, %v6899_v43  ;;  %v4707_v18 = vmul.f32 %v6064_v14, %v6901_v44  ;;  %v4378_v19 = vpop.f32.mrb[51].mxu1 }
 0x26c   : > { %v4689_v22 = vmul.f32 %v4378_v19, %v6905_v24  ;;  %v4706_v23 = vmul.f32 %v4378_v19, %v6907_v46 }
 0x26d   : > { %v4692_v25 = vadd.f32 %v4690_v17, %v4688_v15  ;;  %v4709_v26 = vadd.f32 %v4707_v18, %v4705_v16 }
 0x26e   : > { %v4691_v27 = vadd.f32 %v4689_v22, %v4687_v20  ;;  %v4708_v28 = vadd.f32 %v4706_v23, %v4704_v21  ;;  %v6074_v29 = vpop.f32.mrb[52].mxu1 }
 0x26f   : > { %v4694_v30 = vmul.f32 %v6074_v29, %v6917_v56  ;;  %v4711_v31 = vmul.f32 %v6074_v29, %v6919_v57  ;;  %v4528_v32 = vpop.f32.mrb[53].mxu1 }
 0x270   : > { %v4693_v33 = vmul.f32 %v4528_v32, %v6921_v60  ;;  %v4710_v34 = vmul.f32 %v4528_v32, %v6923_v61 }
 0x271   : > { %v4696_v35 = vadd.f32 %v4694_v30, %v4692_v25  ;;  %v4713_v37 = vadd.f32 %v4711_v31, %v4709_v26 }
 0x272   : > { %v4695_v38 = vadd.f32 %v4693_v33, %v4691_v27  ;;  %v4712_v41 = vadd.f32 %v4710_v34, %v4708_v28  ;;  %v6084_v47 = vpop.f32.mrb[54].mxu1 }
 0x273   : > { %v4698_v36 = vmul.f32 %v6084_v47, %v6929_v6  ;;  %v4715_v48 = vmul.f32 %v6084_v47, %v6931_v7  ;;  %v4678_v49 = vpop.f32.mrb[55].mxu1 }
 0x274   : > { %v4697_v50 = vmul.f32 %v4678_v49, %v6933_v10  ;;  %v4714_v51 = vmul.f32 %v4678_v49, %v6935_v11 }
 0x275   : > { %v4700_v52 = vadd.f32 %v4698_v36, %v4696_v35  ;;  %v4717_v53 = vadd.f32 %v4715_v48, %v4713_v37 }
 0x276   : > { %v4699_v54 = vadd.f32 %v4697_v50, %v4695_v38  ;;  %v4716_v55 = vadd.f32 %v4714_v51, %v4712_v41  ;;  %v6094_v58 = vpop.f32.mrb[56].mxu1 }
 0x277   : > { %5615 = vst.msk [vmem:[%s6943_s28 + $0xc8] sm:$0xff] %vm897_vm2, %v4700_v52  ;;  %5617 = vst.msk [vmem:[%s6943_s28 + $0xd8] sm:$0xff] %vm897_vm2, %v4717_v53  ;;  %v4862_v59 = vpop.f32.mrb[57].mxu1  ;;  %v5322_v63 = vmul.f32 %v6094_v58, %v6893_v39  ;;  %v5339_v0 = vmul.f32 %v6094_v58, %v6895_v40 }
 0x278   : > { %5614 = vst.msk [vmem:[%s6943_s28 + $0xc0] sm:$0xff] %vm897_vm2, %v4699_v54  ;;  %5616 = vst.msk [vmem:[%s6943_s28 + $0xd0] sm:$0xff] %vm897_vm2, %v4716_v55  ;;  %v5321_v4 = vmul.f32 %v4862_v59, %v6897_v42  ;;  %v5338_v5 = vmul.f32 %v4862_v59, %v6903_v45 }
 0x27a   : > { %v6104_v62 = vpop.f32.mrb[58].mxu1 }
 0x27b   : > { %v5324_v1 = vmul.f32 %v6104_v62, %v6899_v43  ;;  %v5341_v2 = vmul.f32 %v6104_v62, %v6901_v44  ;;  %v5012_v3 = vpop.f32.mrb[59].mxu1 }
 0x27c   : > { %v5323_v8 = vmul.f32 %v5012_v3, %v6905_v24  ;;  %v5340_v9 = vmul.f32 %v5012_v3, %v6907_v46 }
 0x27d   : > { %v5326_v12 = vadd.f32 %v5324_v1, %v5322_v63  ;;  %v5343_v13 = vadd.f32 %v5341_v2, %v5339_v0 }
 0x27e   : > { %v5325_v39 = vadd.f32 %v5323_v8, %v5321_v4  ;;  %v5342_v14 = vadd.f32 %v5340_v9, %v5338_v5  ;;  %v6114_v40 = vpop.f32.mrb[60].mxu1 }
 0x27f   : > { %v5328_v43 = vmul.f32 %v6114_v40, %v6917_v56  ;;  %v5345_v44 = vmul.f32 %v6114_v40, %v6919_v57  ;;  %v5162_v15 = vpop.f32.mrb[61].mxu1 }
 0x280   : > { %v5327_v42 = vmul.f32 %v5162_v15, %v6921_v60  ;;  %v5344_v45 = vmul.f32 %v5162_v15, %v6923_v61 }
 0x281   : > { %v5330_v16 = vadd.f32 %v5328_v43, %v5326_v12  ;;  %v5347_v24 = vadd.f32 %v5345_v44, %v5343_v13 }
 0x282   : > { %v5329_v17 = vadd.f32 %v5327_v42, %v5325_v39  ;;  %v5346_v46 = vadd.f32 %v5344_v45, %v5342_v14  ;;  %v6124_v18 = vpop.f32.mrb[62].mxu1 }
 0x283   : > { %v5332_v56 = vmul.f32 %v6124_v18, %v6929_v6  ;;  %v5349_v57 = vmul.f32 %v6124_v18, %v6931_v7  ;;  %v5312_v19 = vpop.f32.mrb[63].mxu1 }
 0x284   : > { %v5331_v60 = vmul.f32 %v5312_v19, %v6933_v10  ;;  %v5348_v61 = vmul.f32 %v5312_v19, %v6935_v11 }
 0x285   : > { %v5334_v20 = vadd.f32 %v5332_v56, %v5330_v16  ;;  %v5351_v21 = vadd.f32 %v5349_v57, %v5347_v24 }
 0x286   : > { %v5333_v6 = vadd.f32 %v5331_v60, %v5329_v17  ;;  %v5350_v7 = vadd.f32 %v5348_v61, %v5346_v46 }
 0x287   : > { %5635 = vst.msk [vmem:[%s6943_s28 + $0xe8] sm:$0xff] %vm897_vm2, %v5334_v20  ;;  %5637 = vst.msk [vmem:[%s6943_s28 + $0xf8] sm:$0xff] %vm897_vm2, %v5351_v21 }
 0x288   : > { %5634 = vst.msk [vmem:[%s6943_s28 + $0xe0] sm:$0xff] %vm897_vm2, %v5333_v6  ;;  %5636 = vst.msk [vmem:[%s6943_s28 + $0xf0] sm:$0xff] %vm897_vm2, %v5350_v7 }
 0x289   : > { %6275 = shalt.err (!%p6272_p5)
}
 0x28a   : > { %s6276_s25 = scalar_lea.hbm %s7118_s13, 4096  ;;  %s6280_s21 = scalar_lea.hbm %s7181_s4, 8192 }
 0x28b   : > { %p6277_p9 = scmp.ne.s32.totalorder %s7118_s13, %s6276_s25  ;;  %p6281_p3 = scmp.lt.u32.totalorder %s7118_s13, %s7181_s4 }
 0x28c   : > { %p6282_p7 = scmp.lt.u32.totalorder %s6280_s21, %s6276_s25  ;;  %p6284_p4 = scmp.lt.u32.totalorder %s6276_s25, %s7118_s13 }
 0x28d   : > { %p6278_p1 = pnand %p6277_p9, %p6483_p10 }
 0x28e   : > { %p6283_p13 = por %p6282_p7, %p6281_p3 }
 0x28f   : > { %p6279_p2 = pneg %p6278_p1 }
 0x290   : > { %p6285_p6 = por %p6284_p4, %p6283_p13 }
 0x292   : > { %p6286_p8 = pnand %p6285_p6, %p6279_p2 }
 0x294   : > { %6289 = shalt.err (!%p6286_p8)
}
 0x295   : > { %s6357_s6 = smov 128   ;;  %s6358_s9 = smov 8  }
 0x296   : > { %6131 = dma.vmem_to_hbm [thread:$0]  (%p6483_p10), %s7120_s29, 4096, %s7118_s13, %s5356_s18, %s6357_s6, %s6357_s6, %s6358_s9  }
 0x297 PF: > { %s5387_s11 = sand.u32 1, %s6328_s15   ;;  %p7199_p12 = scmp.ne.s32.totalorder %s7189_s26, 0 }
 0x298   : > { %p7200_p11 = scmp.ge.s32.totalorder %s6348_s20, 2  ;;  %s5388_s7 = scalar_lea.sflag [#allocation4], %s5387_s11 }
 0x29a   : > { %p6142_p0 = pnand %p7200_p11, %p7199_p12 }
 0x29c   : > { %6323 = dma.done.wait (!%p6142_p0), %s5388_s7, 4096  }
 0x29d   : > { %6325 = vsyncadd (!%p6142_p0), %s5388_s7, 4294963200  ;;  %s21_s20 = sadd.s32 1, %s6348_s20   ;;  %s7201_s15 = smov %s6332_s16 }
 0x29e   : > { %p18_p5 = scmp.ge.s32.totalorder %s21_s20, 4   ;;  %s7202_s16 = smov %s6336_s17 }
 0x29f   : > { %s7203_s17 = smov %s6492_s10  ;;  %s7204_s18 = smov %s6344_s19 }
 0x2a0   : > { %s7205_s19 = smov %s7207_s5  ;;  %20 = sbr.rel (!%p18_p5) target bundleno = 7 (0x7), region = 138 }
 0x2a7   :  { %5393 = vsyncpa [#allocation3], 1 }
 0x2a8   :  { %5395 = vsyncpa [#allocation3 + $0x1], 1 }
 0x2a9   :  { %5396 = vsyncpa [#allocation6], 1 }
 0x2aa   :  { %5397 = vsyncpa [#allocation4], 1 }
 0x2ab   :  { %5399 = vsyncpa [#allocation4 + $0x1], 1 }

</bundles_post_ra>
